<compile_context>
chip_gen: v7x
topology: tpu7x:2x2x1
jax: 0.10.0
libtpu: 0.0.40
codegen_flags: <defaults>
</compile_context>

<pallas_src>
import jax
import jax.numpy as jnp
from jax import lax
from jax.experimental import pallas as pl
from jax.experimental.pallas import tpu as pltpu

EPS = 1e-5
NEG_PAD = -1e30      # bias value for padded logit lanes (killed by log-softmax)
IN_FEATS = 149
IN_PAD = 256         # padded K for the first matmul

# Row offsets of each weight inside the (1536, 128) bf16 slab (all 128-aligned,
# hence also aligned to the bf16 (16,128) sublane tiling).
ROW_W1, N_W1 = 0, 256      # Linear(149->64)  padded to (256,128)
ROW_W2, N_W2 = 256, 128    # Linear(64->32)   padded to (128,128)
ROW_W4, N_W4 = 384, 512    # Linear(512->128)          (512,128)
ROW_W5, N_W5 = 896, 128    # Linear(128->5)   padded to (128,128)
ROW_W7, N_W7 = 1024, 512   # Linear(512->2)   padded to (512,128)
WSLAB_ROWS = 1536

# 128-lane-aligned offsets inside the packed (1, 3072) parameter vector.
OFF_G1, OFF_BE1 = 0, 128        # gamma/beta of BN(64)  (padded to 128)
OFF_G2, OFF_BE2 = 256, 384      # gamma/beta of BN(32)  (padded to 128)
OFF_G36, OFF_BE36 = 512, 1536   # gamma/beta of fused BN(512|512) -> 1024 lanes
OFF_G4, OFF_BE4 = 2560, 2688    # gamma/beta of BN(128)
OFF_B5, OFF_B7 = 2816, 2944     # padded biases of the two final linears
PVEC_LEN = 3072


# --------------------------------------------------------------------------- #
# Kernel
# --------------------------------------------------------------------------- #
def dann_kernel(x_ref, wslab_ref, w36_ref, p_ref, class_ref, domain_ref,
                xpad_ref):
    B = x_ref.shape[0]
    inv_b = 1.0 / float(B)

    def pv(off, n):                       # (1, n) f32 slice of the packed vector
        return p_ref[:, off:off + n]

    def mm(a, w):                         # bf16 MXU operands, f32 accumulation
        return jnp.dot(a.astype(jnp.bfloat16), w,
                       preferred_element_type=jnp.float32)

    def bn_relu(z, g, be):
        # Training-mode BatchNorm1d over the batch, folded into one affine.
        # Two *independent* reductions (shorter dependency chain).
        s1 = jnp.sum(z, axis=0, keepdims=True)
        s2 = jnp.sum(z * z, axis=0, keepdims=True)
        mu = s1 * inv_b
        var = jnp.maximum(s2 * inv_b - mu * mu, 0.0)   # clamp tiny negatives
        s = g * lax.rsqrt(var + EPS)
        t = be - mu * s
        return jnp.maximum(z * s + t, 0.0)

    def log_softmax(z):
        m = jnp.max(z, axis=1, keepdims=True)
        zs = z - m
        return zs - jnp.log(jnp.sum(jnp.exp(zs), axis=1, keepdims=True))

    # ---- pad input 149 -> 256 lanes inside VMEM (no extra HBM pass) --------
    xpad_ref[...] = jnp.zeros_like(xpad_ref)
    xpad_ref[:, 0:IN_FEATS] = x_ref[...]
    x = xpad_ref[...]                                   # (B, 256) f32

    # ---- feature extractor (hidden widths padded to 128 lanes) -------------
    h = bn_relu(mm(x, wslab_ref[ROW_W1:ROW_W1 + N_W1, :]),
                pv(OFF_G1, 128), pv(OFF_BE1, 128))      # (B, 128), cols 64+ are 0
    feat = bn_relu(mm(h, wslab_ref[ROW_W2:ROW_W2 + N_W2, :]),
                   pv(OFF_G2, 128), pv(OFF_BE2, 128))   # (B, 128), cols 32+ are 0
    # ReverseLayerF is identity in the forward pass (alpha is backward-only).

    # ---- fused branch entry: (B,128) @ (128,1024), split 512 | 512 ---------
    cd = bn_relu(mm(feat, w36_ref[...]),
                 pv(OFF_G36, 1024), pv(OFF_BE36, 1024))
    c_act = cd[:, :512]
    d_act = cd[:, 512:]

    # ---- class classifier: 512 -> 128 -> 5 (padded to 128), LogSoftmax -----
    c_act = bn_relu(mm(c_act, wslab_ref[ROW_W4:ROW_W4 + N_W4, :]),
                    pv(OFF_G4, 128), pv(OFF_BE4, 128))
    class_ref[...] = log_softmax(
        mm(c_act, wslab_ref[ROW_W5:ROW_W5 + N_W5, :]) + pv(OFF_B5, 128))

    # ---- domain classifier: 512 -> 2 (padded to 128), LogSoftmax -----------
    domain_ref[...] = log_softmax(
        mm(d_act, wslab_ref[ROW_W7:ROW_W7 + N_W7, :]) + pv(OFF_B7, 128))


# --------------------------------------------------------------------------- #
# Parameters (torch-style init) + kernel-layout packing
# --------------------------------------------------------------------------- #
def init_params(key):
    """Deterministic torch.nn.Linear-style init; BN gamma=1, beta=0."""
    def linear(k, fan_in, fan_out):
        kw, kb = jax.random.split(k)
        bound = 1.0 / jnp.sqrt(float(fan_in))
        w = jax.random.uniform(kw, (fan_in, fan_out), jnp.float32, -bound, bound)
        b = jax.random.uniform(kb, (fan_out,), jnp.float32, -bound, bound)
        return w, b

    keys = jax.random.split(key, 7)
    r = {}
    r["w1"], r["b1"] = linear(keys[0], 149, 64)
    r["w2"], r["b2"] = linear(keys[1], 64, 32)
    r["w3"], r["b3"] = linear(keys[2], 32, 512)
    r["w4"], r["b4"] = linear(keys[3], 512, 128)
    r["w5"], r["b5"] = linear(keys[4], 128, 5)
    r["w6"], r["b6"] = linear(keys[5], 32, 512)
    r["w7"], r["b7"] = linear(keys[6], 512, 2)
    for name, n in (("1", 64), ("2", 32), ("3", 512), ("4", 128), ("6", 512)):
        r["g" + name] = jnp.ones((n,), jnp.float32)
        r["be" + name] = jnp.zeros((n,), jnp.float32)
    return r


def pack_params(r):
    """Pack torch-layout params into the kernel's fused / padded / bf16 layout."""
    bf16 = lambda a: a.astype(jnp.bfloat16)

    # Width-128-padded weights (padded rows/cols are zero -> exact).
    w1k = jnp.zeros((IN_PAD, 128), jnp.float32).at[:149, :64].set(r["w1"])
    w2k = jnp.zeros((128, 128), jnp.float32).at[:64, :32].set(r["w2"])
    w4k = r["w4"]                                                     # (512,128)
    w5k = jnp.zeros((128, 128), jnp.float32).at[:, :5].set(r["w5"])
    w7k = jnp.zeros((512, 128), jnp.float32).at[:, :2].set(r["w7"])
    wslab = bf16(jnp.concatenate([w1k, w2k, w4k, w5k, w7k], axis=0))  # (1536,128)
    assert wslab.shape == (WSLAB_ROWS, 128)

    w36k = bf16(jnp.zeros((128, 1024), jnp.float32)
                .at[:32].set(jnp.concatenate([r["w3"], r["w6"]], axis=1)))

    b5p = jnp.full((128,), NEG_PAD, jnp.float32).at[:5].set(r["b5"])
    b7p = jnp.full((128,), NEG_PAD, jnp.float32).at[:2].set(r["b7"])
    g36 = jnp.concatenate([r["g3"], r["g6"]])
    be36 = jnp.concatenate([r["be3"], r["be6"]])

    def seg128(v):                      # pad a 1-D vector to a multiple of 128
        return jnp.pad(v, (0, (-v.shape[0]) % 128))

    pvec = jnp.concatenate([
        seg128(r["g1"]), seg128(r["be1"]),       # padded gamma lanes are 0
        seg128(r["g2"]), seg128(r["be2"]),
        seg128(g36), seg128(be36),
        seg128(r["g4"]), seg128(r["be4"]),
        seg128(b5p), seg128(b7p),
    ]).reshape(1, -1)
    assert pvec.shape == (1, PVEC_LEN)
    # b1/b2/b3/b4/b6 intentionally omitted: a constant per-feature shift before
    # BatchNorm cancels exactly in the mean subtraction.
    return (wslab, w36k, pvec)


# --------------------------------------------------------------------------- #
# Wrapper
# --------------------------------------------------------------------------- #
def dann_forward(x, packed, alpha=1.0, return_padded=False):
    # alpha only matters for the backward pass (gradient reversal); forward = id.
    del alpha
    x = x.astype(jnp.float32)
    B = x.shape[0]
    wslab, w36k, pvec = packed

    vmem = pl.BlockSpec(memory_space=pltpu.MemorySpace.VMEM)

    flops = 2 * B * (256 * 128 + 128 * 128 + 128 * 1024
                     + 512 * 128 + 128 * 128 + 512 * 128)
    transcendentals = B * (2 * 128 + 2) + (128 + 128 + 1024 + 128)  # exp/log/rsqrt
    in_bytes = x.size * 4 + pvec.size * 4 + wslab.size * 2 + w36k.size * 2
    out_bytes = 2 * B * 128 * 4
    bytes_accessed = in_bytes + out_bytes

    # Explicit VMEM budget (v5e scoped default is only 16 MiB).
    scratch_bytes = B * IN_PAD * 4
    live_bytes = B * (1024 + 2 * 512 + 6 * 128 + IN_PAD) * 4
    vmem_limit = int(min(64 << 20,
                         max(16 << 20,
                             2 * (in_bytes + out_bytes)
                             + scratch_bytes + live_bytes + (4 << 20))))

    c_pad, d_pad = pl.pallas_call(
        dann_kernel,
        out_shape=(jax.ShapeDtypeStruct((B, 128), jnp.float32),
                   jax.ShapeDtypeStruct((B, 128), jnp.float32)),
        in_specs=[vmem, vmem, vmem, vmem],
        out_specs=(vmem, vmem),
        scratch_shapes=[pltpu.VMEM((B, IN_PAD), jnp.float32)],
        compiler_params=pltpu.CompilerParams(vmem_limit_bytes=vmem_limit),
        cost_estimate=pl.CostEstimate(flops=flops,
                                      transcendentals=transcendentals,
                                      bytes_accessed=bytes_accessed),
    )(x, wslab, w36k, pvec)

    if return_padded:
        # Lane-dense padded logits; real lanes are [:5] / [:2], pads are ~-1e30.
        return c_pad, d_pad
    return c_pad[:, :5], d_pad[:, :2]


# --------------------------------------------------------------------------- #
# References
# --------------------------------------------------------------------------- #
def _reference_f32(x, r):
    """Faithful f32 torch-equivalent reference (semantics check)."""
    def bn_relu(z, g, be):
        mu = jnp.mean(z, axis=0, keepdims=True)
        var = jnp.mean((z - mu) ** 2, axis=0, keepdims=True)
        return jnp.maximum((z - mu) / jnp.sqrt(var + EPS) * g + be, 0.0)

    def logsm(z):
        return z - jax.scipy.special.logsumexp(z, axis=1, keepdims=True)

    h = bn_relu(x @ r["w1"] + r["b1"], r["g1"], r["be1"])
    f = bn_relu(h @ r["w2"] + r["b2"], r["g2"], r["be2"])
    c = bn_relu(f @ r["w3"] + r["b3"], r["g3"], r["be3"])
    c = bn_relu(c @ r["w4"] + r["b4"], r["g4"], r["be4"])
    c = logsm(c @ r["w5"] + r["b5"])
    d = bn_relu(f @ r["w6"] + r["b6"], r["g6"], r["be6"])
    d = logsm(d @ r["w7"] + r["b7"])
    return c, d


def _reference_bf16(x, packed):
    """Plain-JAX mirror of the kernel math (bf16 MXU operands) — tight check."""
    wslab, w36k, pvec = packed
    w1 = wslab[ROW_W1:ROW_W1 + N_W1]
    w2 = wslab[ROW_W2:ROW_W2 + N_W2]
    w4 = wslab[ROW_W4:ROW_W4 + N_W4]
    w5 = wslab[ROW_W5:ROW_W5 + N_W5]
    w7 = wslab[ROW_W7:ROW_W7 + N_W7]
    pv = lambda off, n: pvec[:, off:off + n]
    mm = lambda a, w: jnp.dot(a.astype(jnp.bfloat16), w,
                              preferred_element_type=jnp.float32)
    B = x.shape[0]
    inv_b = 1.0 / float(B)

    def bn_relu(z, g, be):
        mu = jnp.sum(z, axis=0, keepdims=True) * inv_b
        var = jnp.maximum(jnp.sum(z * z, axis=0, keepdims=True) * inv_b - mu * mu, 0.0)
        s = g * lax.rsqrt(var + EPS)
        t = be - mu * s
        return jnp.maximum(z * s + t, 0.0)

    def logsm(z):
        m = jnp.max(z, axis=1, keepdims=True)
        zs = z - m
        return zs - jnp.log(jnp.sum(jnp.exp(zs), axis=1, keepdims=True))

    xp = jnp.zeros((B, IN_PAD), jnp.float32).at[:, :149].set(x)
    h = bn_relu(mm(xp, w1), pv(OFF_G1, 128), pv(OFF_BE1, 128))
    feat = bn_relu(mm(h, w2), pv(OFF_G2, 128), pv(OFF_BE2, 128))
    cd = bn_relu(mm(feat, w36k), pv(OFF_G36, 1024), pv(OFF_BE36, 1024))
    c, d = cd[:, :512], cd[:, 512:]
    c = bn_relu(mm(c, w4), pv(OFF_G4, 128), pv(OFF_BE4, 128))
    co = logsm(mm(c, w5) + pv(OFF_B5, 128))[:, :5]
    do = logsm(mm(d, w7) + pv(OFF_B7, 128))[:, :2]
    return co, do


# --------------------------------------------------------------------------- #
if __name__ == "__main__":
    key = jax.random.PRNGKey(0)
    kx, kp = jax.random.split(key)

    B = 8
    x = jax.random.normal(kx, (B, 149), jnp.float32)
    raw = init_params(kp)
    packed = pack_params(raw)
    alpha = 0.5  # unused in forward (gradient reversal is backward-only)

    class_out, domain_out = jax.block_until_ready(dann_forward(x, packed, alpha))
    assert class_out.shape == (B, 5) and domain_out.shape == (B, 2)

    # Tight check against a reference that mirrors the kernel's bf16 MXU math.
    rc, rd = _reference_bf16(x, packed)
    assert jnp.allclose(class_out, rc, atol=2e-3, rtol=2e-3)
    assert jnp.allclose(domain_out, rd, atol=2e-3, rtol=2e-3)

    # Semantic check against the faithful f32 torch-equivalent reference
    # (looser tolerance only because of the bf16 MXU operands).
    fc, fd = _reference_f32(x, raw)
    assert jnp.allclose(class_out, fc, atol=1e-1, rtol=1e-1)
    assert jnp.allclose(domain_out, fd, atol=1e-1, rtol=1e-1)

    print("KERNEL_OK")
</pallas_src>

<mosaic_0001>
module attributes {stable_mosaic.version = 11 : i64} {
  func.func @dann_kernel(%arg0: memref<8x149xf32, #tpu.memory_space<vmem>>, %arg1: memref<1536x128xbf16, #tpu.memory_space<vmem>>, %arg2: memref<128x1024xbf16, #tpu.memory_space<vmem>>, %arg3: memref<1x3072xf32, #tpu.memory_space<vmem>>, %arg4: memref<8x128xf32, #tpu.memory_space<vmem>>, %arg5: memref<8x128xf32, #tpu.memory_space<vmem>>, %arg6: memref<8x256xf32, #tpu.memory_space<vmem>>) attributes {dimension_semantics = [], scalar_prefetch = 0 : i64, scratch_operands = 1 : i64, tpu.core_type = #tpu.core_type<tc>} {
    %cst = arith.constant 0.000000e+00 : f32
    %0 = vector.broadcast %cst : f32 to vector<8x256xf32>
    %c0 = arith.constant 0 : index
    %c0_0 = arith.constant 0 : index
    %1 = vector.load %arg6[%c0, %c0_0] : memref<8x256xf32, #tpu.memory_space<vmem>>, vector<8x256xf32>
    tpu.vector_store %arg6[%c0, %c0_0], %0 {strides = array<i32>} : memref<8x256xf32, #tpu.memory_space<vmem>>, vector<8x256xf32>,
    %c0_1 = arith.constant 0 : index
    %c0_2 = arith.constant 0 : index
    %2 = vector.load %arg0[%c0_1, %c0_2] : memref<8x149xf32, #tpu.memory_space<vmem>>, vector<8x149xf32>
    %c0_3 = arith.constant 0 : index
    %c0_4 = arith.constant 0 : index
    %3 = vector.load %arg6[%c0_3, %c0_4] : memref<8x256xf32, #tpu.memory_space<vmem>>, vector<8x149xf32>
    tpu.vector_store %arg6[%c0_3, %c0_4], %2 {strides = array<i32>} : memref<8x256xf32, #tpu.memory_space<vmem>>, vector<8x149xf32>,
    %c0_5 = arith.constant 0 : index
    %c0_6 = arith.constant 0 : index
    %4 = vector.load %arg6[%c0_5, %c0_6] : memref<8x256xf32, #tpu.memory_space<vmem>>, vector<8x256xf32>
    %c0_7 = arith.constant 0 : index
    %c0_8 = arith.constant 0 : index
    %5 = vector.load %arg1[%c0_7, %c0_8] : memref<1536x128xbf16, #tpu.memory_space<vmem>>, vector<256x128xbf16>
    %6 = arith.truncf %4 : vector<8x256xf32> to vector<8x256xbf16>
    %cst_9 = arith.constant dense<0.000000e+00> : vector<8x128xf32>
    %7 = tpu.matmul %6, %5, %cst_9 {dimension_numbers = #tpu.dot_dimension_numbers<[1], [0], [0], [1], [0, 0, 1, 1], [], []>} : vector<8x256xbf16>, vector<256x128xbf16>, vector<8x128xf32> -> vector<8x128xf32>
    %c0_10 = arith.constant 0 : index
    %c0_11 = arith.constant 0 : index
    %8 = vector.load %arg3[%c0_10, %c0_11] : memref<1x3072xf32, #tpu.memory_space<vmem>>, vector<1x128xf32>
    %c0_12 = arith.constant 0 : index
    %c128 = arith.constant 128 : index
    %9 = vector.load %arg3[%c0_12, %c128] : memref<1x3072xf32, #tpu.memory_space<vmem>>, vector<1x128xf32>
    %cst_13 = arith.constant dense<0.000000e+00> : vector<128xf32>
    %10 = vector.multi_reduction <add>, %7, %cst_13 [0] : vector<8x128xf32> to vector<128xf32>
    %11 = vector.shape_cast %10 : vector<128xf32> to vector<1x128xf32>
    %12 = arith.mulf %7, %7 : vector<8x128xf32>
    %cst_14 = arith.constant dense<0.000000e+00> : vector<128xf32>
    %13 = vector.multi_reduction <add>, %12, %cst_14 [0] : vector<8x128xf32> to vector<128xf32>
    %14 = vector.shape_cast %13 : vector<128xf32> to vector<1x128xf32>
    %cst_15 = arith.constant 1.250000e-01 : f32
    %15 = vector.broadcast %cst_15 : f32 to vector<1x128xf32>
    %16 = arith.mulf %11, %15 : vector<1x128xf32>
    %cst_16 = arith.constant 1.250000e-01 : f32
    %17 = vector.broadcast %cst_16 : f32 to vector<1x128xf32>
    %18 = arith.mulf %14, %17 : vector<1x128xf32>
    %19 = arith.mulf %16, %16 : vector<1x128xf32>
    %20 = arith.subf %18, %19 : vector<1x128xf32>
    %cst_17 = arith.constant 0.000000e+00 : f32
    %21 = vector.broadcast %cst_17 : f32 to vector<1x128xf32>
    %22 = arith.maximumf %20, %21 : vector<1x128xf32>
    %cst_18 = arith.constant 9.99999974E-6 : f32
    %23 = vector.broadcast %cst_18 : f32 to vector<1x128xf32>
    %24 = arith.addf %22, %23 : vector<1x128xf32>
    %25 = math.rsqrt %24 : vector<1x128xf32>
    %26 = arith.mulf %8, %25 : vector<1x128xf32>
    %27 = arith.mulf %16, %26 : vector<1x128xf32>
    %28 = arith.subf %9, %27 : vector<1x128xf32>
    %29 = vector.broadcast %26 : vector<1x128xf32> to vector<8x128xf32>
    %30 = arith.mulf %7, %29 : vector<8x128xf32>
    %31 = vector.broadcast %28 : vector<1x128xf32> to vector<8x128xf32>
    %32 = arith.addf %30, %31 : vector<8x128xf32>
    %cst_19 = arith.constant 0.000000e+00 : f32
    %33 = vector.broadcast %cst_19 : f32 to vector<8x128xf32>
    %34 = arith.maximumf %32, %33 : vector<8x128xf32>
    %c256 = arith.constant 256 : index
    %c0_20 = arith.constant 0 : index
    %35 = vector.load %arg1[%c256, %c0_20] : memref<1536x128xbf16, #tpu.memory_space<vmem>>, vector<128x128xbf16>
    %36 = arith.truncf %34 : vector<8x128xf32> to vector<8x128xbf16>
    %cst_21 = arith.constant dense<0.000000e+00> : vector<8x128xf32>
    %37 = tpu.matmul %36, %35, %cst_21 {dimension_numbers = #tpu.dot_dimension_numbers<[1], [0], [0], [1], [0, 0, 1, 1], [], []>} : vector<8x128xbf16>, vector<128x128xbf16>, vector<8x128xf32> -> vector<8x128xf32>
    %c0_22 = arith.constant 0 : index
    %c256_23 = arith.constant 256 : index
    %38 = vector.load %arg3[%c0_22, %c256_23] : memref<1x3072xf32, #tpu.memory_space<vmem>>, vector<1x128xf32>
    %c0_24 = arith.constant 0 : index
    %c384 = arith.constant 384 : index
    %39 = vector.load %arg3[%c0_24, %c384] : memref<1x3072xf32, #tpu.memory_space<vmem>>, vector<1x128xf32>
    %cst_25 = arith.constant dense<0.000000e+00> : vector<128xf32>
    %40 = vector.multi_reduction <add>, %37, %cst_25 [0] : vector<8x128xf32> to vector<128xf32>
    %41 = vector.shape_cast %40 : vector<128xf32> to vector<1x128xf32>
    %42 = arith.mulf %37, %37 : vector<8x128xf32>
    %cst_26 = arith.constant dense<0.000000e+00> : vector<128xf32>
    %43 = vector.multi_reduction <add>, %42, %cst_26 [0] : vector<8x128xf32> to vector<128xf32>
    %44 = vector.shape_cast %43 : vector<128xf32> to vector<1x128xf32>
    %cst_27 = arith.constant 1.250000e-01 : f32
    %45 = vector.broadcast %cst_27 : f32 to vector<1x128xf32>
    %46 = arith.mulf %41, %45 : vector<1x128xf32>
    %cst_28 = arith.constant 1.250000e-01 : f32
    %47 = vector.broadcast %cst_28 : f32 to vector<1x128xf32>
    %48 = arith.mulf %44, %47 : vector<1x128xf32>
    %49 = arith.mulf %46, %46 : vector<1x128xf32>
    %50 = arith.subf %48, %49 : vector<1x128xf32>
    %cst_29 = arith.constant 0.000000e+00 : f32
    %51 = vector.broadcast %cst_29 : f32 to vector<1x128xf32>
    %52 = arith.maximumf %50, %51 : vector<1x128xf32>
    %cst_30 = arith.constant 9.99999974E-6 : f32
    %53 = vector.broadcast %cst_30 : f32 to vector<1x128xf32>
    %54 = arith.addf %52, %53 : vector<1x128xf32>
    %55 = math.rsqrt %54 : vector<1x128xf32>
    %56 = arith.mulf %38, %55 : vector<1x128xf32>
    %57 = arith.mulf %46, %56 : vector<1x128xf32>
    %58 = arith.subf %39, %57 : vector<1x128xf32>
    %59 = vector.broadcast %56 : vector<1x128xf32> to vector<8x128xf32>
    %60 = arith.mulf %37, %59 : vector<8x128xf32>
    %61 = vector.broadcast %58 : vector<1x128xf32> to vector<8x128xf32>
    %62 = arith.addf %60, %61 : vector<8x128xf32>
    %cst_31 = arith.constant 0.000000e+00 : f32
    %63 = vector.broadcast %cst_31 : f32 to vector<8x128xf32>
    %64 = arith.maximumf %62, %63 : vector<8x128xf32>
    %c0_32 = arith.constant 0 : index
    %c0_33 = arith.constant 0 : index
    %65 = vector.load %arg2[%c0_32, %c0_33] : memref<128x1024xbf16, #tpu.memory_space<vmem>>, vector<128x1024xbf16>
    %66 = arith.truncf %64 : vector<8x128xf32> to vector<8x128xbf16>
    %cst_34 = arith.constant dense<0.000000e+00> : vector<8x1024xf32>
    %67 = tpu.matmul %66, %65, %cst_34 {dimension_numbers = #tpu.dot_dimension_numbers<[1], [0], [0], [1], [0, 0, 1, 1], [], []>} : vector<8x128xbf16>, vector<128x1024xbf16>, vector<8x1024xf32> -> vector<8x1024xf32>
    %c0_35 = arith.constant 0 : index
    %c512 = arith.constant 512 : index
    %68 = vector.load %arg3[%c0_35, %c512] : memref<1x3072xf32, #tpu.memory_space<vmem>>, vector<1x1024xf32>
    %c0_36 = arith.constant 0 : index
    %c1536 = arith.constant 1536 : index
    %69 = vector.load %arg3[%c0_36, %c1536] : memref<1x3072xf32, #tpu.memory_space<vmem>>, vector<1x1024xf32>
    %cst_37 = arith.constant dense<0.000000e+00> : vector<1024xf32>
    %70 = vector.multi_reduction <add>, %67, %cst_37 [0] : vector<8x1024xf32> to vector<1024xf32>
    %71 = vector.shape_cast %70 : vector<1024xf32> to vector<1x1024xf32>
    %72 = arith.mulf %67, %67 : vector<8x1024xf32>
    %cst_38 = arith.constant dense<0.000000e+00> : vector<1024xf32>
    %73 = vector.multi_reduction <add>, %72, %cst_38 [0] : vector<8x1024xf32> to vector<1024xf32>
    %74 = vector.shape_cast %73 : vector<1024xf32> to vector<1x1024xf32>
    %cst_39 = arith.constant 1.250000e-01 : f32
    %75 = vector.broadcast %cst_39 : f32 to vector<1x1024xf32>
    %76 = arith.mulf %71, %75 : vector<1x1024xf32>
    %cst_40 = arith.constant 1.250000e-01 : f32
    %77 = vector.broadcast %cst_40 : f32 to vector<1x1024xf32>
    %78 = arith.mulf %74, %77 : vector<1x1024xf32>
    %79 = arith.mulf %76, %76 : vector<1x1024xf32>
    %80 = arith.subf %78, %79 : vector<1x1024xf32>
    %cst_41 = arith.constant 0.000000e+00 : f32
    %81 = vector.broadcast %cst_41 : f32 to vector<1x1024xf32>
    %82 = arith.maximumf %80, %81 : vector<1x1024xf32>
    %cst_42 = arith.constant 9.99999974E-6 : f32
    %83 = vector.broadcast %cst_42 : f32 to vector<1x1024xf32>
    %84 = arith.addf %82, %83 : vector<1x1024xf32>
    %85 = math.rsqrt %84 : vector<1x1024xf32>
    %86 = arith.mulf %68, %85 : vector<1x1024xf32>
    %87 = arith.mulf %76, %86 : vector<1x1024xf32>
    %88 = arith.subf %69, %87 : vector<1x1024xf32>
    %89 = vector.broadcast %86 : vector<1x1024xf32> to vector<8x1024xf32>
    %90 = arith.mulf %67, %89 : vector<8x1024xf32>
    %91 = vector.broadcast %88 : vector<1x1024xf32> to vector<8x1024xf32>
    %92 = arith.addf %90, %91 : vector<8x1024xf32>
    %cst_43 = arith.constant 0.000000e+00 : f32
    %93 = vector.broadcast %cst_43 : f32 to vector<8x1024xf32>
    %94 = arith.maximumf %92, %93 : vector<8x1024xf32>
    %95 = vector.extract_strided_slice %94 {offsets = [0, 0], sizes = [8, 512], strides = [1, 1]} : vector<8x1024xf32> to vector<8x512xf32>
    %96 = vector.extract_strided_slice %94 {offsets = [0, 512], sizes = [8, 512], strides = [1, 1]} : vector<8x1024xf32> to vector<8x512xf32>
    %c384_44 = arith.constant 384 : index
    %c0_45 = arith.constant 0 : index
    %97 = vector.load %arg1[%c384_44, %c0_45] : memref<1536x128xbf16, #tpu.memory_space<vmem>>, vector<512x128xbf16>
    %98 = arith.truncf %95 : vector<8x512xf32> to vector<8x512xbf16>
    %cst_46 = arith.constant dense<0.000000e+00> : vector<8x128xf32>
    %99 = tpu.matmul %98, %97, %cst_46 {dimension_numbers = #tpu.dot_dimension_numbers<[1], [0], [0], [1], [0, 0, 1, 1], [], []>} : vector<8x512xbf16>, vector<512x128xbf16>, vector<8x128xf32> -> vector<8x128xf32>
    %c0_47 = arith.constant 0 : index
    %c2560 = arith.constant 2560 : index
    %100 = vector.load %arg3[%c0_47, %c2560] : memref<1x3072xf32, #tpu.memory_space<vmem>>, vector<1x128xf32>
    %c0_48 = arith.constant 0 : index
    %c2688 = arith.constant 2688 : index
    %101 = vector.load %arg3[%c0_48, %c2688] : memref<1x3072xf32, #tpu.memory_space<vmem>>, vector<1x128xf32>
    %cst_49 = arith.constant dense<0.000000e+00> : vector<128xf32>
    %102 = vector.multi_reduction <add>, %99, %cst_49 [0] : vector<8x128xf32> to vector<128xf32>
    %103 = vector.shape_cast %102 : vector<128xf32> to vector<1x128xf32>
    %104 = arith.mulf %99, %99 : vector<8x128xf32>
    %cst_50 = arith.constant dense<0.000000e+00> : vector<128xf32>
    %105 = vector.multi_reduction <add>, %104, %cst_50 [0] : vector<8x128xf32> to vector<128xf32>
    %106 = vector.shape_cast %105 : vector<128xf32> to vector<1x128xf32>
    %cst_51 = arith.constant 1.250000e-01 : f32
    %107 = vector.broadcast %cst_51 : f32 to vector<1x128xf32>
    %108 = arith.mulf %103, %107 : vector<1x128xf32>
    %cst_52 = arith.constant 1.250000e-01 : f32
    %109 = vector.broadcast %cst_52 : f32 to vector<1x128xf32>
    %110 = arith.mulf %106, %109 : vector<1x128xf32>
    %111 = arith.mulf %108, %108 : vector<1x128xf32>
    %112 = arith.subf %110, %111 : vector<1x128xf32>
    %cst_53 = arith.constant 0.000000e+00 : f32
    %113 = vector.broadcast %cst_53 : f32 to vector<1x128xf32>
    %114 = arith.maximumf %112, %113 : vector<1x128xf32>
    %cst_54 = arith.constant 9.99999974E-6 : f32
    %115 = vector.broadcast %cst_54 : f32 to vector<1x128xf32>
    %116 = arith.addf %114, %115 : vector<1x128xf32>
    %117 = math.rsqrt %116 : vector<1x128xf32>
    %118 = arith.mulf %100, %117 : vector<1x128xf32>
    %119 = arith.mulf %108, %118 : vector<1x128xf32>
    %120 = arith.subf %101, %119 : vector<1x128xf32>
    %121 = vector.broadcast %118 : vector<1x128xf32> to vector<8x128xf32>
    %122 = arith.mulf %99, %121 : vector<8x128xf32>
    %123 = vector.broadcast %120 : vector<1x128xf32> to vector<8x128xf32>
    %124 = arith.addf %122, %123 : vector<8x128xf32>
    %cst_55 = arith.constant 0.000000e+00 : f32
    %125 = vector.broadcast %cst_55 : f32 to vector<8x128xf32>
    %126 = arith.maximumf %124, %125 : vector<8x128xf32>
    %c896 = arith.constant 896 : index
    %c0_56 = arith.constant 0 : index
    %127 = vector.load %arg1[%c896, %c0_56] : memref<1536x128xbf16, #tpu.memory_space<vmem>>, vector<128x128xbf16>
    %128 = arith.truncf %126 : vector<8x128xf32> to vector<8x128xbf16>
    %cst_57 = arith.constant dense<0.000000e+00> : vector<8x128xf32>
    %129 = tpu.matmul %128, %127, %cst_57 {dimension_numbers = #tpu.dot_dimension_numbers<[1], [0], [0], [1], [0, 0, 1, 1], [], []>} : vector<8x128xbf16>, vector<128x128xbf16>, vector<8x128xf32> -> vector<8x128xf32>
    %c0_58 = arith.constant 0 : index
    %c2816 = arith.constant 2816 : index
    %130 = vector.load %arg3[%c0_58, %c2816] : memref<1x3072xf32, #tpu.memory_space<vmem>>, vector<1x128xf32>
    %131 = vector.broadcast %130 : vector<1x128xf32> to vector<8x128xf32>
    %132 = arith.addf %129, %131 : vector<8x128xf32>
    %cst_59 = arith.constant dense<0xFF800000> : vector<8xf32>
    %133 = vector.multi_reduction <maximumf>, %132, %cst_59 [1] : vector<8x128xf32> to vector<8xf32>
    %134 = vector.shape_cast %133 : vector<8xf32> to vector<8x1xf32>
    %135 = vector.broadcast %134 : vector<8x1xf32> to vector<8x128xf32>
    %136 = arith.subf %132, %135 : vector<8x128xf32>
    %137 = math.exp %136 : vector<8x128xf32>
    %cst_60 = arith.constant dense<0.000000e+00> : vector<8xf32>
    %138 = vector.multi_reduction <add>, %137, %cst_60 [1] : vector<8x128xf32> to vector<8xf32>
    %139 = vector.shape_cast %138 : vector<8xf32> to vector<8x1xf32>
    %140 = math.log %139 : vector<8x1xf32>
    %141 = vector.broadcast %140 : vector<8x1xf32> to vector<8x128xf32>
    %142 = arith.subf %136, %141 : vector<8x128xf32>
    %c0_61 = arith.constant 0 : index
    %c0_62 = arith.constant 0 : index
    %143 = vector.load %arg4[%c0_61, %c0_62] : memref<8x128xf32, #tpu.memory_space<vmem>>, vector<8x128xf32>
    tpu.vector_store %arg4[%c0_61, %c0_62], %142 {strides = array<i32>} : memref<8x128xf32, #tpu.memory_space<vmem>>, vector<8x128xf32>,
    %c1024 = arith.constant 1024 : index
    %c0_63 = arith.constant 0 : index
    %144 = vector.load %arg1[%c1024, %c0_63] : memref<1536x128xbf16, #tpu.memory_space<vmem>>, vector<512x128xbf16>
    %145 = arith.truncf %96 : vector<8x512xf32> to vector<8x512xbf16>
    %cst_64 = arith.constant dense<0.000000e+00> : vector<8x128xf32>
    %146 = tpu.matmul %145, %144, %cst_64 {dimension_numbers = #tpu.dot_dimension_numbers<[1], [0], [0], [1], [0, 0, 1, 1], [], []>} : vector<8x512xbf16>, vector<512x128xbf16>, vector<8x128xf32> -> vector<8x128xf32>
    %c0_65 = arith.constant 0 : index
    %c2944 = arith.constant 2944 : index
    %147 = vector.load %arg3[%c0_65, %c2944] : memref<1x3072xf32, #tpu.memory_space<vmem>>, vector<1x128xf32>
    %148 = vector.broadcast %147 : vector<1x128xf32> to vector<8x128xf32>
    %149 = arith.addf %146, %148 : vector<8x128xf32>
    %cst_66 = arith.constant dense<0xFF800000> : vector<8xf32>
    %150 = vector.multi_reduction <maximumf>, %149, %cst_66 [1] : vector<8x128xf32> to vector<8xf32>
    %151 = vector.shape_cast %150 : vector<8xf32> to vector<8x1xf32>
    %152 = vector.broadcast %151 : vector<8x1xf32> to vector<8x128xf32>
    %153 = arith.subf %149, %152 : vector<8x128xf32>
    %154 = math.exp %153 : vector<8x128xf32>
    %cst_67 = arith.constant dense<0.000000e+00> : vector<8xf32>
    %155 = vector.multi_reduction <add>, %154, %cst_67 [1] : vector<8x128xf32> to vector<8xf32>
    %156 = vector.shape_cast %155 : vector<8xf32> to vector<8x1xf32>
    %157 = math.log %156 : vector<8x1xf32>
    %158 = vector.broadcast %157 : vector<8x1xf32> to vector<8x128xf32>
    %159 = arith.subf %153, %158 : vector<8x128xf32>
    %c0_68 = arith.constant 0 : index
    %c0_69 = arith.constant 0 : index
    %160 = vector.load %arg5[%c0_68, %c0_69] : memref<8x128xf32, #tpu.memory_space<vmem>>, vector<8x128xf32>
    tpu.vector_store %arg5[%c0_68, %c0_69], %159 {strides = array<i32>} : memref<8x128xf32, #tpu.memory_space<vmem>>, vector<8x128xf32>,
    return
  }
}

</mosaic_0001>

<bundles_post_ra>
// kernel: tpu_custom_call.1
= control target key start
LH: loop header
LB: loop body
LE: loop exit
PB: predicated region body
PF: predicated region fallthrough
CT: control target
= control target key end

     0   :  { %11 = vsyncpa [#allocation4], 0  ;;  %s3176_s0 = inlined_call_operand.hbm [shape: f32[8,149], index: 0, kind: input, shape index: {}]   ;;  %s3177_s1 = inlined_call_operand.hbm [shape: bf16[1536,128], index: 1, kind: input, shape index: {}]   ;;  %s3178_s2 = inlined_call_operand.hbm [shape: bf16[128,1024], index: 2, kind: input, shape index: {}]   ;;  %s3179_s3 = inlined_call_operand.hbm [shape: f32[1,3072], index: 3, kind: input, shape index: {}]   ;;  %s3180_s4 = inlined_call_operand.hbm [shape: f32[8,128], index: 4, kind: output, shape index: {0}]   ;;  %s3181_s5 = inlined_call_operand.hbm [shape: f32[8,128], index: 5, kind: output, shape index: {1}]  }
   0x1   :  { %12 = vsyncpa [#allocation7], 0 }
   0x2   :  { %13 = vsyncpa [#allocation10], 0 }
   0x3   :  { %14 = vsyncpa [#allocation5], 0 }
   0x4   :  { %15 = vsyncpa [#allocation13], 0  ;;  %s2884_s18 = smov [#allocation6]   ;;  %s2742_s22 = scalar_lea.hbm %s3177_s1, 12288 }
   0x5   :  { %s31_s19 = sshll.u32 %s2884_s18, 4  ;;  %p2743_p0 = scmp.ne.s32.totalorder %s3177_s1, %s2742_s22  ;;  %s32_s19 = int_to_ptr.vmem [resolvable:$true] %s31_s19 }
   0x6   :  { %p2746_p1 = scmp.lt.u32.totalorder %s2742_s22, %s3177_s1 }
   0x8   :  { %p2748_p2 = pnand %p2746_p1, %p2743_p0 }
   0xa   :  { %2751 = shalt.err (!%p2748_p2)
}
   0xb   :  { %s2752_s27 = scalar_lea.vmem %s32_s19, 12288  ;;  %p2757_p4 = scmp.lt.s32.totalorder %s32_s19, %s32_s19 }
   0xc   :  { %p2753_p3 = scmp.ne.s32.totalorder %s32_s19, %s2752_s27  ;;  %p2758_p5 = scmp.lt.s32.totalorder %s2752_s27, %s2752_s27 }
   0xe   :  { %p2759_p6 = por %p2758_p5, %p2757_p4 }
  0x10   :  { %p2760_p7 = pnand %p2759_p6, %p2753_p3 }
  0x12   :  { %2763 = shalt.err (!%p2760_p7)
}
  0x13   :  { %s2885_s28 = smov 64   ;;  %s2886_s29 = smov 4  }
  0x14   :  { %37 = dma.hbm_to_vmem [thread:$0]  %s3177_s1, 12288, %s32_s19, [#allocation7], %s2885_s28, %s2885_s28, %s2886_s29  }
  0x15   :  { %s2887_s7 = smov [#allocation3]   ;;  %s2888_s9 = smov [#allocation8]  }
  0x16   :  { %s22_s8 = sshll.u32 %s2887_s7, 4  ;;  %s43_s10 = sshll.u32 %s2888_s9, 4  ;;  %s23_s8 = int_to_ptr.vmem [resolvable:$true] %s22_s8  ;;  %s44_s10 = int_to_ptr.vmem [resolvable:$true] %s43_s10 }
  0x17   :  { %s2764_s13 = scalar_lea.hbm %s3176_s0, 256 }
  0x18   :  { %p2765_p8 = scmp.ne.s32.totalorder %s3176_s0, %s2764_s13  ;;  %p2768_p9 = scmp.lt.u32.totalorder %s2764_s13, %s3176_s0 }
  0x1a   :  { %p2770_p10 = pnand %p2768_p9, %p2765_p8 }
  0x1c   :  { %2773 = shalt.err (!%p2770_p10)
}
  0x1d   :  { %s2774_s1 = scalar_lea.vmem %s23_s8, 256  ;;  %p2779_p12 = scmp.lt.s32.totalorder %s23_s8, %s23_s8 }
  0x1e   :  { %p2775_p11 = scmp.ne.s32.totalorder %s23_s8, %s2774_s1  ;;  %p2780_p13 = scmp.lt.s32.totalorder %s2774_s1, %s2774_s1 }
  0x20   :  { %p2781_p0 = por %p2780_p13, %p2779_p12 }
  0x22   :  { %p2782_p1 = pnand %p2781_p0, %p2775_p11 }
  0x24   :  { %2785 = shalt.err (!%p2782_p1)
}
  0x25   :  { %25 = dma.hbm_to_vmem [thread:$0]  %s3176_s0, 256, %s23_s8, [#allocation4]  }
  0x26   :  { %s2786_s22 = scalar_lea.hbm %s3178_s2, 8192 }
  0x27   :  { %p2787_p2 = scmp.ne.s32.totalorder %s3178_s2, %s2786_s22  ;;  %p2790_p3 = scmp.lt.u32.totalorder %s2786_s22, %s3178_s2 }
  0x29   :  { %p2792_p4 = pnand %p2790_p3, %p2787_p2 }
  0x2b   :  { %2795 = shalt.err (!%p2792_p4)
}
  0x2c   :  { %s2796_s27 = scalar_lea.vmem %s44_s10, 8192  ;;  %p2801_p6 = scmp.lt.s32.totalorder %s44_s10, %s44_s10 }
  0x2d   :  { %p2797_p5 = scmp.ne.s32.totalorder %s44_s10, %s2796_s27  ;;  %p2802_p7 = scmp.lt.s32.totalorder %s2796_s27, %s2796_s27 }
  0x2f   :  { %p2803_p8 = por %p2802_p7, %p2801_p6 }
  0x31   :  { %p2804_p9 = pnand %p2803_p8, %p2797_p5 }
  0x33   :  { %2807 = shalt.err (!%p2804_p9)
}
  0x34   :  { %s2889_s0 = smov 512   ;;  %s2890_s28 = smov 32  }
  0x35   :  { %49 = dma.hbm_to_vmem [thread:$0]  %s3178_s2, 8192, %s44_s10, [#allocation7], %s2889_s0, %s2889_s0, %s2890_s28  }
  0x36   :  { %s2891_s6 = smov [#allocation9]   ;;  %s2808_s11 = scalar_lea.hbm %s3179_s3, 384 }
  0x37   :  { %s56_s7 = sshll.u32 %s2891_s6, 4  ;;  %p2809_p10 = scmp.ne.s32.totalorder %s3179_s3, %s2808_s11  ;;  %s57_s7 = int_to_ptr.vmem [resolvable:$true] %s56_s7 }
  0x38   :  { %p2812_p11 = scmp.lt.u32.totalorder %s2808_s11, %s3179_s3 }
  0x3a   :  { %p2814_p12 = pnand %p2812_p11, %p2809_p10 }
  0x3c   :  { %2817 = shalt.err (!%p2814_p12)
}
  0x3d   :  { %s2818_s16 = scalar_lea.vmem %s57_s7, 384  ;;  %p2823_p0 = scmp.lt.s32.totalorder %s57_s7, %s57_s7 }
  0x3e   :  { %p2819_p13 = scmp.ne.s32.totalorder %s57_s7, %s2818_s16  ;;  %p2824_p1 = scmp.lt.s32.totalorder %s2818_s16, %s2818_s16 }
  0x40   :  { %p2825_p2 = por %p2824_p1, %p2823_p0 }
  0x42   :  { %p2826_p3 = pnand %p2825_p2, %p2819_p13 }
  0x44   :  { %2829 = shalt.err (!%p2826_p3)
}
  0x45   :  { %59 = dma.hbm_to_vmem [thread:$0]  %s3179_s3, 384, %s57_s7, [#allocation10]  }
  0x46   :  { %2874 = dma.done.wait [#allocation4], 256  }
  0x47   :  { %2875 = vsyncadd [#allocation4], 4294967040 }
  0x48   :  { %2876 = dma.done.wait [#allocation7], 20480  }
  0x49   :  { %2877 = vsyncadd [#allocation7], 4294946816 }
  0x4a   :  { %2878 = dma.done.wait [#allocation10], 384  }
  0x4b   :  { %2879 = vsyncadd [#allocation10], 4294966912  ;;  %v2892_v0 = vmov 0.0   ;;  %v2616_v1 = vld [vmem:[#allocation6 + $0x40] sm:$0xff]   ;;  %v2618_v3 = vld [vmem:[#allocation6 + $0x48] sm:$0xff]   ;;  %vm78_vm0 = vcmask 171008   ;;  %v278_v54 = vlaneseq }
  0x4c   :  { %74 = vst [vmem:[#allocation2 + $0x8] sm:$0xff] %v2892_v0  ;;  %2562 = vmatprep.subr.bf16.mxu1 %v2892_v0  ;;  %v2617_v2 = vld [vmem:[#allocation6] sm:$0xff]   ;;  %2434 = vmatprep.subr.bf16.mxu0 %v2616_v1  ;;  %v2619_v4 = vld [vmem:[#allocation6 + $0x8] sm:$0xff]   ;;  %v2620_v5 = vld [vmem:[#allocation6 + $0x50] sm:$0xff]   ;;  %vm2893_vm1 = vmmov 0   ;;  %s2896_s3 = smov [#allocation11]  }
  0x4d   :  { %2435 = vmatpush3.bf16.msra.mxu0 %v2617_v2  ;;  %v2621_v6 = vld [vmem:[#allocation6 + $0x10] sm:$0xff]   ;;  %v2622_v7 = vld [vmem:[#allocation6 + $0x58] sm:$0xff]   ;;  %v2624_v9 = vld [vmem:[#allocation6 + $0x60] sm:$0xff]   ;;  %2578 = vmatprep.mubr.msk.bf16.mxu1 %vm2893_vm1, %v2892_v0  ;;  %v2987_v55 = vshrl.u32 %v278_v54, 7  ;;  %s2247_s17 = sshll.u32 %s2896_s3, 4  ;;  %s2248_s17 = int_to_ptr.vmem [resolvable:$true] %s2247_s17 }
  0x4e   :  { %2436 = vmatprep.subr.bf16.mxu0 %v2618_v3  ;;  %v2623_v8 = vld [vmem:[#allocation6 + $0x18] sm:$0xff]   ;;  %v2625_v10 = vld [vmem:[#allocation6 + $0x20] sm:$0xff]   ;;  %v2626_v11 = vld [vmem:[#allocation6 + $0x68] sm:$0xff]   ;;  %s2830_s1 = scalar_lea.vmem %s2248_s17, 128  ;;  %p2835_p5 = scmp.lt.s32.totalorder %s2248_s17, %s2248_s17 }
  0x4f   :  { %v76_v12 = vld [vmem:[#allocation3 + $0x8] sm:$0xff]  ;;  %v75_v13 = vld [vmem:[#allocation3] sm:$0xff]  ;;  %v2627_v14 = vld [vmem:[#allocation6 + $0x28] sm:$0xff]   ;;  %v2990_v57 = vsub.s32 0, %v2987_v55  ;;  %p2831_p4 = scmp.ne.s32.totalorder %s2248_s17, %s2830_s1  ;;  %p2836_p6 = scmp.lt.s32.totalorder %s2830_s1, %s2830_s1 }
  0x50   :  { %79 = vst.msk [vmem:[#allocation2 + $0x8] sm:$0xff] %vm78_vm0, %v76_v12  ;;  %v2628_v15 = vld [vmem:[#allocation6 + $0x70] sm:$0xff]   ;;  %v2630_v17 = vld [vmem:[#allocation6 + $0x78] sm:$0xff]   ;;  %v114_v21 = vpack.c.bf16 %v75_v13, %v75_v13  ;;  %v2632_v22 = vld [vmem:[#allocation6 + $0x80] sm:$0xff]  }
  0x51   :  { %2437 = vmatpush3.bf16.msra.mxu0 %v2619_v4  ;;  %v2629_v16 = vld [vmem:[#allocation6 + $0x30] sm:$0xff]   ;;  %v2631_v19 = vld [vmem:[#allocation6 + $0x38] sm:$0xff]   ;;  %2563 = vmatpush3.bf16.msra.mxu1 %v2632_v22  ;;  %v2633_v23 = vld [vmem:[#allocation6 + $0x88] sm:$0xff]   ;;  %p2837_p7 = por %p2836_p6, %p2835_p5 }
  0x52   :  { %2438 = vmatprep.subr.bf16.mxu0 %v2620_v5  ;;  %2564 = vmatprep.subr.bf16.mxu1 %v2892_v0  ;;  %v2634_v24 = vld [vmem:[#allocation6 + $0x90] sm:$0xff]   ;;  %v2635_v25 = vld [vmem:[#allocation6 + $0x98] sm:$0xff]   ;;  %v2636_v26 = vld [vmem:[#allocation6 + $0xa0] sm:$0xff]  }
  0x53   :  { %v2637_v27 = vld [vmem:[#allocation6 + $0xa8] sm:$0xff]   ;;  %v2638_v28 = vld [vmem:[#allocation6 + $0xb0] sm:$0xff]   ;;  %v2639_v29 = vld [vmem:[#allocation6 + $0xb8] sm:$0xff]   ;;  %p2838_p8 = pnand %p2837_p7, %p2831_p4 }
  0x54   :  { %v252_v56 = vld [vmem:[#allocation9] sm:$0x1]  ;;  %v253_v60 = vld [vmem:[#allocation9 + $0x1] sm:$0x1] }
  0x55   :  { %2439 = vmatpush3.bf16.msra.mxu0 %v2621_v6  ;;  %2565 = vmatpush3.bf16.msra.mxu1 %v2633_v23  ;;  %v437_v6 = vld [vmem:[#allocation8] sm:$0xff] }
  0x56   :  { %2440 = vmatprep.subr.bf16.mxu0 %v2622_v7  ;;  %2566 = vmatprep.subr.bf16.mxu1 %v2892_v0  ;;  %v441_v7 = vld [vmem:[#allocation8 + $0x20] sm:$0xff] }
  0x57   :  { %v81_v18 = vld [vmem:[#allocation2 + $0x8] sm:$0xff]  ;;  %v453_v22 = vld [vmem:[#allocation8 + $0x80] sm:$0xff] }
  0x58   :  { %v115_v20 = vpack.c.bf16 %v81_v18, %v81_v18  ;;  %v450_v18 = vld [vmem:[#allocation8 + $0x68] sm:$0xff]  ;;  %v457_v23 = vld [vmem:[#allocation8 + $0xa0] sm:$0xff] }
  0x59   :  { %2441 = vmatpush3.bf16.msra.mxu0 %v2623_v8  ;;  %2567 = vmatpush3.bf16.msra.mxu1 %v2634_v24  ;;  %v438_v8 = vld [vmem:[#allocation8 + $0x8] sm:$0xff]  ;;  %v485_v54 = vld [vmem:[#allocation8 + $0x180] sm:$0xff] }
  0x5a   :  { %2442 = vmatprep.subr.bf16.mxu0 %v2624_v9  ;;  %244 = vmatprep.mubr.bf16.mxu0 %v115_v20  ;;  %v2297_v9 = vcombine.high %v437_v6, %v441_v7  ;;  %v454_v24 = vld [vmem:[#allocation8 + $0x88] sm:$0xff] }
  0x5b   :  { %2568 = vmatprep.subr.bf16.mxu1 %v2892_v0 }
  0x5d   :  { %2443 = vmatpush3.bf16.msra.mxu0 %v2625_v10  ;;  %2569 = vmatpush3.bf16.msra.mxu1 %v2635_v25  ;;  %v442_v10 = vld [vmem:[#allocation8 + $0x28] sm:$0xff]  ;;  %v2313_v25 = vcombine.high %v453_v22, %v457_v23 }
  0x5e   :  { %2444 = vmatprep.subr.bf16.mxu0 %v2626_v11  ;;  %2570 = vmatprep.subr.bf16.mxu1 %v2892_v0  ;;  %v2296_v11 = vcombine.low %v437_v6, %v441_v7  ;;  %v2298_v12 = vcombine.low %v438_v8, %v442_v10  ;;  %v2299_v13 = vcombine.high %v438_v8, %v442_v10  ;;  %v2996_v10 = vld [vmem:[#allocation8 + $0x30] sm:$0xff] }
  0x61   :  { %2445 = vmatpush3.bf16.msra.mxu0 %v2627_v14  ;;  %2571 = vmatpush3.bf16.msra.mxu1 %v2636_v26  ;;  %v445_v14 = vld [vmem:[#allocation8 + $0x40] sm:$0xff]  ;;  %v458_v26 = vld [vmem:[#allocation8 + $0xa8] sm:$0xff] }
  0x62   :  { %2446 = vmatprep.subr.bf16.mxu0 %v2628_v15  ;;  %2572 = vmatprep.subr.bf16.mxu1 %v2892_v0  ;;  %v449_v15 = vld [vmem:[#allocation8 + $0x60] sm:$0xff] }
  0x65   :  { %2447 = vmatpush3.bf16.msra.mxu0 %v2629_v16  ;;  %2573 = vmatpush3.bf16.msra.mxu1 %v2637_v27  ;;  %v446_v16 = vld [vmem:[#allocation8 + $0x48] sm:$0xff]  ;;  %v2312_v27 = vcombine.low %v453_v22, %v457_v23 }
  0x66   :  { %2448 = vmatprep.subr.bf16.mxu0 %v2630_v17  ;;  %2574 = vmatprep.subr.bf16.mxu1 %v2892_v0  ;;  %v2305_v17 = vcombine.high %v445_v14, %v449_v15  ;;  %v2306_v20 = vcombine.low %v446_v16, %v450_v18 }
  0x69   :  { %2449 = vmatpush3.bf16.msra.mxu0 %v2631_v19  ;;  %2575 = vmatpush3.bf16.msra.mxu1 %v2638_v28  ;;  %v2304_v19 = vcombine.low %v445_v14, %v449_v15  ;;  %v2314_v28 = vcombine.low %v454_v24, %v458_v26  ;;  %v444_v15 = vld [vmem:[#allocation8 + $0x38] sm:$0xff] }
  0x6a   :  { %2576 = vmatprep.subr.bf16.mxu1 %v2892_v0  ;;  %822 = vmatprep.subr.bf16.mxu0 %v2297_v9  ;;  %v2994_v9 = vld [vmem:[#allocation8 + $0x10] sm:$0xff] }
  0x6b   :  { %v2301_v14 = vcombine.high %v2994_v9, %v2996_v10 }
  0x6c   :  { %245 = vmatmul.mubr.bf16.vlgmr.msra.gmra.mrb[0].mxu0 %v114_v21  ;;  %v2307_v21 = vcombine.high %v446_v16, %v450_v18 }
  0x6d   :  { %2577 = vmatpush3.bf16.msra.mxu1 %v2639_v29  ;;  %823 = vmatpush1.bf16.msra.mxu0 %v2296_v11  ;;  %v2315_v29 = vcombine.high %v454_v24, %v458_v26  ;;  %v2998_v11 = vld [vmem:[#allocation8 + $0x18] sm:$0xff] }
  0x6e   :  { %863 = vmatprep.subr.bf16.mxu1 %v2299_v13  ;;  %824 = vmatprep.subr.bf16.mxu0 %v2305_v17  ;;  %v2300_v13 = vcombine.low %v2994_v9, %v2996_v10  ;;  %v2302_v16 = vcombine.low %v2998_v11, %v444_v15  ;;  %v2303_v17 = vcombine.high %v2998_v11, %v444_v15  ;;  %v468_v9 = vld [vmem:[#allocation8 + $0xf8] sm:$0xff]  ;;  %v471_v15 = vld [vmem:[#allocation8 + $0x110] sm:$0xff] }
  0x71   :  { %825 = vmatpush1.bf16.msra.mxu0 %v2304_v19 }
  0x72   :  { %826 = vmatprep.subr.bf16.mxu0 %v2313_v25 }
  0x75   :  { %827 = vmatpush1.bf16.msra.mxu0 %v2312_v27 }
 0x13f   :  { %v2450_v30 = vpop.f32.mrb[0].mxu0 }
 0x140   :  { %v2451_v31 = vpop.f32.mrb[1].mxu0 }
 0x141   :  { %v2452_v32 = vadd.f32 %v2451_v31, %v2450_v30  ;;  %v2453_v33 = vpop.f32.mrb[2].mxu0  ;;  %v461_v30 = vld [vmem:[#allocation8 + $0xc0] sm:$0xff] }
 0x142   :  { %v2454_v34 = vpop.f32.mrb[3].mxu0  ;;  %v465_v31 = vld [vmem:[#allocation8 + $0xe0] sm:$0xff] }
 0x143   :  { %v254_v35 = vrot.slane %v2452_v32, 4  ;;  %v260_v36 = vmul.f32 %v2452_v32, %v2452_v32  ;;  %v2321_v33 = vcombine.high %v461_v30, %v465_v31  ;;  %v466_v34 = vld [vmem:[#allocation8 + $0xe8] sm:$0xff] }
 0x145   :  { %v255_v37 = vadd.f32 %v2452_v32, %v254_v35  ;;  %v261_v38 = vrot.slane %v260_v36, 4  ;;  %v2320_v35 = vcombine.low %v461_v30, %v465_v31  ;;  %828 = vmatprep.subr.bf16.mxu0 %v2321_v33 }
 0x147   :  { %v256_v39 = vrot.slane %v255_v37, 2  ;;  %v262_v40 = vadd.f32 %v261_v38, %v260_v36  ;;  %829 = vmatpush1.bf16.msra.mxu0 %v2320_v35  ;;  %v469_v38 = vld [vmem:[#allocation8 + $0x100] sm:$0xff] }
 0x149   :  { %v257_v41 = vadd.f32 %v256_v39, %v255_v37  ;;  %v263_v42 = vrot.slane %v262_v40, 2  ;;  %v473_v39 = vld [vmem:[#allocation8 + $0x120] sm:$0xff] }
 0x14b   :  { %v258_v43 = vrot.slane %v257_v41, 1  ;;  %v264_v44 = vadd.f32 %v263_v42, %v262_v40  ;;  %v470_v40 = vld [vmem:[#allocation8 + $0x108] sm:$0xff] }
 0x14c   :  { %v474_v42 = vld [vmem:[#allocation8 + $0x128] sm:$0xff] }
 0x14d   :  { %v259_v45 = vadd.f32 %v258_v43, %v257_v41  ;;  %v265_v46 = vrot.slane %v264_v44, 1  ;;  %v2329_v41 = vcombine.high %v469_v38, %v473_v39  ;;  %v2328_v43 = vcombine.low %v469_v38, %v473_v39 }
 0x14f   :  { %v266_v47 = vadd.f32 %v265_v46, %v264_v44  ;;  %v267_v48 = vmul.f32 0.125, %v259_v45  ;;  %v2330_v44 = vcombine.low %v470_v40, %v474_v42  ;;  %v2331_v45 = vcombine.high %v470_v40, %v474_v42  ;;  %830 = vmatprep.subr.bf16.mxu0 %v2329_v41  ;;  %v477_v46 = vld [vmem:[#allocation8 + $0x140] sm:$0xff] }
 0x150   :  { %831 = vmatpush1.bf16.msra.mxu0 %v2328_v43  ;;  %v397_v41 = vld [vmem:[#allocation9 + $0x2] sm:$0x1] }
 0x151   :  { %v268_v49 = vmul.f32 0.125, %v266_v47  ;;  %v269_v50 = vmul.f32 %v267_v48, %v267_v48  ;;  %v481_v47 = vld [vmem:[#allocation8 + $0x160] sm:$0xff] }
 0x153   :  { %v270_v51 = vsub.f32 %v268_v49, %v269_v50  ;;  %v2337_v49 = vcombine.high %v477_v46, %v481_v47  ;;  %v482_v50 = vld [vmem:[#allocation8 + $0x168] sm:$0xff] }
 0x155   :  { %v271_v52 = vmax.f32 %v270_v51, 0.0  ;;  %v2336_v51 = vcombine.low %v477_v46, %v481_v47  ;;  %832 = vmatprep.subr.bf16.mxu0 %v2337_v49 }
 0x157   :  { %v272_v53 = vadd.f32 1e-05, %v271_v52  ;;  %833 = vmatpush1.bf16.msra.mxu0 %v2336_v51  ;;  %v447_v51 = vld [vmem:[#allocation8 + $0x50] sm:$0xff] }
 0x159   :  { %2712 = vrsqrt.f32 %v272_v53 }
 0x163   :  { %v2713_v58 = vpop.eup %2712 }
 0x164   :  { %v274_v59 = vmul.f32 %v2713_v58, %v252_v56  ;;  %v489_v56 = vld [vmem:[#allocation8 + $0x1a0] sm:$0xff]  ;;  %v486_v58 = vld [vmem:[#allocation8 + $0x188] sm:$0xff] }
 0x166   :  { %v275_v61 = vmul.f32 %v274_v59, %v267_v48  ;;  %v281_v62 = vrot.slane %v274_v59, %v2990_v57  ;;  %v478_v48 = vld [vmem:[#allocation8 + $0x148] sm:$0xff]  ;;  %v2345_v59 = vcombine.high %v485_v54, %v489_v56 }
 0x167   :  { %v2338_v52 = vcombine.low %v478_v48, %v482_v50  ;;  %v2339_v53 = vcombine.high %v478_v48, %v482_v50 }
 0x168   :  { %v276_v63 = vsub.f32 %v253_v60, %v275_v61  ;;  %v283_v1 = vmul.f32 %v2452_v32, %v281_v62  ;;  %v462_v32 = vld [vmem:[#allocation8 + $0xc8] sm:$0xff]  ;;  %v2344_v61 = vcombine.low %v485_v54, %v489_v56  ;;  %834 = vmatprep.subr.bf16.mxu0 %v2345_v59  ;;  %v452_v54 = vld [vmem:[#allocation8 + $0x78] sm:$0xff] }
 0x169   :  { %v2322_v36 = vcombine.low %v462_v32, %v466_v34  ;;  %v2323_v37 = vcombine.high %v462_v32, %v466_v34  ;;  %v490_v60 = vld [vmem:[#allocation8 + $0x1a8] sm:$0xff] }
 0x16a   :  { %v288_v2 = vrot.slane %v276_v63, %v2990_v57  ;;  %v2346_v62 = vcombine.low %v486_v58, %v490_v60  ;;  %v2347_v63 = vcombine.high %v486_v58, %v490_v60  ;;  %835 = vmatpush1.bf16.msra.mxu0 %v2344_v61  ;;  %v455_v61 = vld [vmem:[#allocation8 + $0x90] sm:$0xff] }
 0x16c   :  { %v290_v3 = vadd.f32 %v288_v2, %v283_v1  ;;  %v493_v1 = vld [vmem:[#allocation8 + $0x1c0] sm:$0xff] }
 0x16d   :  { %v497_v2 = vld [vmem:[#allocation8 + $0x1e0] sm:$0xff] }
 0x16e   :  { %v291_v4 = vmax.f32 %v290_v3, 0.0  ;;  %v494_v3 = vld [vmem:[#allocation8 + $0x1c8] sm:$0xff]  ;;  %v2352_v6 = vcombine.low %v493_v1, %v497_v2 }
 0x170   :  { %v308_v5 = vpack.c.bf16 %v291_v4, %v291_v4  ;;  %v2353_v4 = vcombine.high %v493_v1, %v497_v2  ;;  %v460_v1 = vld [vmem:[#allocation8 + $0xb8] sm:$0xff] }
 0x172   :  { %2579 = vmatmul.mubr.bf16.vlgmr.msra.gmra.mrb[0].mxu1 %v308_v5  ;;  %v498_v5 = vld [vmem:[#allocation8 + $0x1e8] sm:$0xff]  ;;  %836 = vmatprep.subr.bf16.mxu0 %v2353_v4 }
 0x173   :  { %864 = vmatpush1.bf16.msra.mxu1 %v2298_v12  ;;  %v2354_v7 = vcombine.low %v494_v3, %v498_v5  ;;  %v2355_v8 = vcombine.high %v494_v3, %v498_v5  ;;  %v2894_v12 = vmov 0   ;;  %837 = vmatpush1.bf16.msra.mxu0 %v2352_v6  ;;  %v463_v6 = vld [vmem:[#allocation8 + $0xd0] sm:$0xff] }
 0x174   :  { %865 = vmatprep.subr.bf16.mxu1 %v2307_v21  ;;  %854 = vmatprep.mubr.bf16.mxu0 %v2894_v12 }
 0x175   :  { %895 = vmatprep.mubr.bf16.mxu1 %v2894_v12  ;;  %904 = vmatprep.subr.bf16.mxu0 %v2301_v14 }
 0x177   :  { %866 = vmatpush1.bf16.msra.mxu1 %v2306_v20 }
 0x178   :  { %867 = vmatprep.subr.bf16.mxu1 %v2315_v29 }
 0x17b   :  { %868 = vmatpush1.bf16.msra.mxu1 %v2314_v28 }
 0x17c   :  { %869 = vmatprep.subr.bf16.mxu1 %v2323_v37 }
 0x17f   :  { %870 = vmatpush1.bf16.msra.mxu1 %v2322_v36 }
 0x180   :  { %871 = vmatprep.subr.bf16.mxu1 %v2331_v45 }
 0x183   :  { %872 = vmatpush1.bf16.msra.mxu1 %v2330_v44  ;;  %v398_v44 = vld [vmem:[#allocation9 + $0x3] sm:$0x1] }
 0x184   :  { %873 = vmatprep.subr.bf16.mxu1 %v2339_v53  ;;  %v448_v53 = vld [vmem:[#allocation8 + $0x58] sm:$0xff] }
 0x185   :  { %v2311_v60 = vcombine.high %v448_v53, %v452_v54  ;;  %v2310_v3 = vcombine.low %v448_v53, %v452_v54  ;;  %v2645_v53 = vld [vmem:[#allocation6 + $0x108] sm:$0xff]  }
 0x186   :  { %v2646_v54 = vld [vmem:[#allocation6 + $0x148] sm:$0xff]  }
 0x187   :  { %874 = vmatpush1.bf16.msra.mxu1 %v2338_v52  ;;  %v451_v52 = vld [vmem:[#allocation8 + $0x70] sm:$0xff] }
 0x188   :  { %875 = vmatprep.subr.bf16.mxu1 %v2347_v63  ;;  %v2309_v59 = vcombine.high %v447_v51, %v451_v52  ;;  %v456_v63 = vld [vmem:[#allocation8 + $0x98] sm:$0xff]  ;;  %v2308_v2 = vcombine.low %v447_v51, %v451_v52  ;;  %v2643_v51 = vld [vmem:[#allocation6 + $0xc0] sm:$0xff]   ;;  %v2644_v52 = vld [vmem:[#allocation6 + $0x188] sm:$0xff]  }
 0x189   :  { %v2319_v5 = vcombine.high %v456_v63, %v460_v1  ;;  %v2318_v11 = vcombine.low %v456_v63, %v460_v1  ;;  %v2653_v63 = vld [vmem:[#allocation6 + $0x118] sm:$0xff]  }
 0x18a   :  { %v2654_v1 = vld [vmem:[#allocation6 + $0x158] sm:$0xff]  }
 0x18b   :  { %876 = vmatpush1.bf16.msra.mxu1 %v2346_v62  ;;  %v459_v62 = vld [vmem:[#allocation8 + $0xb0] sm:$0xff] }
 0x18c   :  { %877 = vmatprep.subr.bf16.mxu1 %v2355_v8  ;;  %v2317_v4 = vcombine.high %v455_v61, %v459_v62  ;;  %v464_v8 = vld [vmem:[#allocation8 + $0xd8] sm:$0xff]  ;;  %v2316_v10 = vcombine.low %v455_v61, %v459_v62  ;;  %v2650_v61 = vld [vmem:[#allocation6 + $0x150] sm:$0xff]  }
 0x18d   :  { %v2327_v14 = vcombine.high %v464_v8, %v468_v9  ;;  %v2652_v62 = vld [vmem:[#allocation6 + $0x198] sm:$0xff]  }
 0x18f   :  { %878 = vmatpush1.bf16.msra.mxu1 %v2354_v7  ;;  %v467_v7 = vld [vmem:[#allocation8 + $0xf0] sm:$0xff] }
 0x190   :  { %945 = vmatprep.subr.bf16.mxu1 %v2303_v17  ;;  %v472_v17 = vld [vmem:[#allocation8 + $0x118] sm:$0xff] }
 0x245   :  { %v391_v18 = vpop.f32.mrb[0].mxu1 }
 0x246   :  { %v399_v19 = vrot.slane %v391_v18, 4  ;;  %v405_v20 = vmul.f32 %v391_v18, %v391_v18  ;;  %v2580_v21 = vpop.f32.mrb[1].mxu1 }
 0x247   :  { %v394_v22 = vpop.f32.mrb[2].mxu1 }
 0x248   :  { %v400_v23 = vadd.f32 %v399_v19, %v391_v18  ;;  %v406_v24 = vrot.slane %v405_v20, 4  ;;  %v2581_v25 = vpop.f32.mrb[3].mxu1  ;;  %v2324_v19 = vcombine.low %v463_v6, %v467_v7  ;;  %v479_v22 = vld [vmem:[#allocation8 + $0x150] sm:$0xff] }
 0x249   :  { %v484_v25 = vld [vmem:[#allocation8 + $0x178] sm:$0xff] }
 0x24a   :  { %v401_v26 = vrot.slane %v400_v23, 2  ;;  %v407_v27 = vadd.f32 %v406_v24, %v405_v20  ;;  %v2326_v20 = vcombine.low %v464_v8, %v468_v9  ;;  %v480_v24 = vld [vmem:[#allocation8 + $0x158] sm:$0xff]  ;;  %v2661_v8 = vld [vmem:[#allocation6 + $0x128] sm:$0xff]  }
 0x24b   :  { %v2662_v9 = vld [vmem:[#allocation6 + $0x168] sm:$0xff]  }
 0x24c   :  { %v402_v28 = vadd.f32 %v401_v26, %v400_v23  ;;  %v408_v29 = vrot.slane %v407_v27, 2  ;;  %v483_v23 = vld [vmem:[#allocation8 + $0x170] sm:$0xff] }
 0x24e   :  { %v403_v30 = vrot.slane %v402_v28, 1  ;;  %v409_v31 = vadd.f32 %v408_v29, %v407_v27  ;;  %v2343_v29 = vcombine.high %v480_v24, %v484_v25 }
 0x250   :  { %v404_v32 = vadd.f32 %v403_v30, %v402_v28  ;;  %v410_v33 = vrot.slane %v409_v31, 1  ;;  %v2341_v28 = vcombine.high %v479_v22, %v483_v23  ;;  %v487_v30 = vld [vmem:[#allocation8 + $0x190] sm:$0xff] }
 0x252   :  { %v411_v34 = vadd.f32 %v410_v33, %v409_v31  ;;  %v412_v35 = vmul.f32 0.125, %v404_v32  ;;  %v491_v31 = vld [vmem:[#allocation8 + $0x1b0] sm:$0xff]  ;;  %v488_v32 = vld [vmem:[#allocation8 + $0x198] sm:$0xff] }
 0x253   :  { %v492_v33 = vld [vmem:[#allocation8 + $0x1b8] sm:$0xff] }
 0x254   :  { %v413_v36 = vmul.f32 0.125, %v411_v34  ;;  %v414_v37 = vmul.f32 %v412_v35, %v412_v35  ;;  %v2340_v34 = vcombine.low %v479_v22, %v483_v23 }
 0x256   :  { %v415_v38 = vsub.f32 %v413_v36, %v414_v37  ;;  %v2349_v36 = vcombine.high %v487_v30, %v491_v31  ;;  %v2351_v37 = vcombine.high %v488_v32, %v492_v33 }
 0x258   :  { %v416_v39 = vmax.f32 %v415_v38, 0.0  ;;  %v495_v38 = vld [vmem:[#allocation8 + $0x1d0] sm:$0xff] }
 0x25a   :  { %v417_v40 = vadd.f32 1e-05, %v416_v39  ;;  %v499_v39 = vld [vmem:[#allocation8 + $0x1f0] sm:$0xff] }
 0x25c   :  { %2714 = vrsqrt.f32 %v417_v40  ;;  %v496_v40 = vld [vmem:[#allocation8 + $0x1d8] sm:$0xff] }
 0x266   :  { %v2715_v42 = vpop.eup %2714 }
 0x267   :  { %v419_v43 = vmul.f32 %v2715_v42, %v397_v41  ;;  %v500_v41 = vld [vmem:[#allocation8 + $0x1f8] sm:$0xff]  ;;  %v2348_v42 = vcombine.low %v487_v30, %v491_v31 }
 0x269   :  { %v420_v45 = vmul.f32 %v419_v43, %v412_v35  ;;  %v426_v46 = vrot.slane %v419_v43, %v2990_v57  ;;  %v2342_v35 = vcombine.low %v480_v24, %v484_v25  ;;  %v2350_v43 = vcombine.low %v488_v32, %v492_v33 }
 0x26b   :  { %v421_v47 = vsub.f32 %v398_v44, %v420_v45  ;;  %v428_v48 = vmul.f32 %v426_v46, %v391_v18  ;;  %v476_v18 = vld [vmem:[#allocation8 + $0x138] sm:$0xff]  ;;  %v2357_v44 = vcombine.high %v495_v38, %v499_v39  ;;  %v2359_v45 = vcombine.high %v496_v40, %v500_v41 }
 0x26c   :  { %v2334_v27 = vcombine.low %v472_v17, %v476_v18  ;;  %v2356_v46 = vcombine.low %v495_v38, %v499_v39 }
 0x26d   :  { %v433_v49 = vrot.slane %v421_v47, %v2990_v57  ;;  %v2358_v47 = vcombine.low %v496_v40, %v500_v41 }
 0x26f   :  { %v435_v50 = vadd.f32 %v433_v49, %v428_v48  ;;  %v2640_v48 = vld [vmem:[#allocation6 + $0x180] sm:$0xff]  }
 0x270   :  { %v2641_v49 = vld [vmem:[#allocation6 + $0x100] sm:$0xff]  }
 0x271   :  { %v436_v56 = vmax.f32 %v435_v50, 0.0  ;;  %v2642_v50 = vld [vmem:[#allocation6 + $0x140] sm:$0xff]  }
 0x273   :  { %v3010_v58 = vpack.c.bf16 %v436_v56, %v436_v56  ;;  %v2647_v56 = vld [vmem:[#allocation6 + $0xc8] sm:$0xff]  }
 0x275   :  { %855 = vmatmul.mubr.bf16.vlgmr.msra.gmra.mrb[4].mxu0 %v3010_v58  ;;  %896 = vmatmul.mubr.bf16.vlgmr.msra.gmra.mrb[4].mxu1 %v3010_v58 }
 0x276   :  { %905 = vmatpush1.bf16.msra.mxu0 %v2300_v13  ;;  %946 = vmatpush1.bf16.msra.mxu1 %v2302_v16  ;;  %v2325_v13 = vcombine.high %v463_v6, %v467_v7  ;;  %v475_v16 = vld [vmem:[#allocation8 + $0x130] sm:$0xff]  ;;  %v2659_v6 = vld [vmem:[#allocation6 + $0xe0] sm:$0xff]   ;;  %v2660_v7 = vld [vmem:[#allocation6 + $0x1a8] sm:$0xff]  }
 0x277   :  { %906 = vmatprep.subr.bf16.mxu0 %v2309_v59  ;;  %947 = vmatprep.subr.bf16.mxu1 %v2311_v60  ;;  %v2333_v21 = vcombine.high %v471_v15, %v475_v16  ;;  %v2332_v26 = vcombine.low %v471_v15, %v475_v16  ;;  %v2648_v59 = vld [vmem:[#allocation6 + $0x190] sm:$0xff]   ;;  %v2668_v16 = vld [vmem:[#allocation6 + $0x1b8] sm:$0xff]  }
 0x278   :  { %936 = vmatprep.mubr.bf16.mxu0 %v2894_v12  ;;  %977 = vmatprep.mubr.bf16.mxu1 %v2894_v12  ;;  %v2335_v12 = vcombine.high %v472_v17, %v476_v18  ;;  %v2649_v60 = vld [vmem:[#allocation6 + $0x110] sm:$0xff]   ;;  %v2669_v17 = vld [vmem:[#allocation6 + $0x138] sm:$0xff]  }
 0x279   :  { %v2667_v15 = vld [vmem:[#allocation6 + $0xf0] sm:$0xff]   ;;  %v2670_v18 = vld [vmem:[#allocation6 + $0x178] sm:$0xff]  }
 0x27a   :  { %907 = vmatpush1.bf16.msra.mxu0 %v2308_v2  ;;  %948 = vmatpush1.bf16.msra.mxu1 %v2310_v3  ;;  %v2655_v2 = vld [vmem:[#allocation6 + $0xd8] sm:$0xff]   ;;  %v2656_v3 = vld [vmem:[#allocation6 + $0x1a0] sm:$0xff]  }
 0x27b   :  { %908 = vmatprep.subr.bf16.mxu0 %v2317_v4  ;;  %949 = vmatprep.subr.bf16.mxu1 %v2319_v5  ;;  %v2657_v4 = vld [vmem:[#allocation6 + $0x120] sm:$0xff]  }
 0x27c   :  { %v2658_v5 = vld [vmem:[#allocation6 + $0x160] sm:$0xff]  }
 0x27e   :  { %909 = vmatpush1.bf16.msra.mxu0 %v2316_v10  ;;  %950 = vmatpush1.bf16.msra.mxu1 %v2318_v11  ;;  %v2663_v10 = vld [vmem:[#allocation6 + $0xe8] sm:$0xff]   ;;  %v2664_v11 = vld [vmem:[#allocation6 + $0x1b0] sm:$0xff]  }
 0x27f   :  { %910 = vmatprep.subr.bf16.mxu0 %v2325_v13  ;;  %951 = vmatprep.subr.bf16.mxu1 %v2327_v14  ;;  %v2665_v13 = vld [vmem:[#allocation6 + $0x130] sm:$0xff]  }
 0x280   :  { %v2666_v14 = vld [vmem:[#allocation6 + $0x170] sm:$0xff]  }
 0x282   :  { %911 = vmatpush1.bf16.msra.mxu0 %v2324_v19  ;;  %952 = vmatpush1.bf16.msra.mxu1 %v2326_v20  ;;  %v2671_v19 = vld [vmem:[#allocation6 + $0xf8] sm:$0xff]   ;;  %v2672_v20 = vld [vmem:[#allocation6 + $0x240] sm:$0xff]  }
 0x283   :  { %912 = vmatprep.subr.bf16.mxu0 %v2333_v21  ;;  %953 = vmatprep.subr.bf16.mxu1 %v2335_v12 }
 0x286   :  { %913 = vmatpush1.bf16.msra.mxu0 %v2332_v26  ;;  %954 = vmatpush1.bf16.msra.mxu1 %v2334_v27 }
 0x287   :  { %914 = vmatprep.subr.bf16.mxu0 %v2341_v28  ;;  %955 = vmatprep.subr.bf16.mxu1 %v2343_v29 }
 0x28a   :  { %915 = vmatpush1.bf16.msra.mxu0 %v2340_v34  ;;  %956 = vmatpush1.bf16.msra.mxu1 %v2342_v35 }
 0x28b   :  { %916 = vmatprep.subr.bf16.mxu0 %v2349_v36  ;;  %957 = vmatprep.subr.bf16.mxu1 %v2351_v37 }
 0x28e   :  { %917 = vmatpush1.bf16.msra.mxu0 %v2348_v42  ;;  %958 = vmatpush1.bf16.msra.mxu1 %v2350_v43 }
 0x28f   :  { %918 = vmatprep.subr.bf16.mxu0 %v2357_v44  ;;  %959 = vmatprep.subr.bf16.mxu1 %v2359_v45 }
 0x292   :  { %919 = vmatpush1.bf16.msra.mxu0 %v2356_v46  ;;  %960 = vmatpush1.bf16.msra.mxu1 %v2358_v47 }
 0x293   :  { %2487 = vmatprep.subr.bf16.mxu1 %v2640_v48  ;;  %2465 = vmatprep.subr.bf16.mxu0 %v2641_v49 }
 0x295   :  { %937 = vmatmul.mubr.bf16.vlgmr.msra.gmra.mrb[8].mxu0 %v3010_v58  ;;  %978 = vmatmul.mubr.bf16.vlgmr.msra.gmra.mrb[8].mxu1 %v3010_v58  ;;  %v2651_v58 = vld [vmem:[#allocation6 + $0xd0] sm:$0xff]  }
 0x296   :  { %2488 = vmatpush3.bf16.msra.mxu1 %v2642_v50  ;;  %2466 = vmatpush3.bf16.msra.mxu0 %v2643_v51 }
 0x297   :  { %2489 = vmatprep.subr.bf16.mxu1 %v2644_v52  ;;  %2467 = vmatprep.subr.bf16.mxu0 %v2645_v53 }
 0x29a   :  { %2490 = vmatpush3.bf16.msra.mxu1 %v2646_v54  ;;  %2468 = vmatpush3.bf16.msra.mxu0 %v2647_v56 }
 0x29b   :  { %2491 = vmatprep.subr.bf16.mxu1 %v2648_v59  ;;  %2469 = vmatprep.subr.bf16.mxu0 %v2649_v60 }
 0x29e   :  { %2492 = vmatpush3.bf16.msra.mxu1 %v2650_v61  ;;  %2470 = vmatpush3.bf16.msra.mxu0 %v2651_v58 }
 0x29f   :  { %2493 = vmatprep.subr.bf16.mxu1 %v2652_v62  ;;  %2471 = vmatprep.subr.bf16.mxu0 %v2653_v63 }
 0x2a2   :  { %2494 = vmatpush3.bf16.msra.mxu1 %v2654_v1  ;;  %2472 = vmatpush3.bf16.msra.mxu0 %v2655_v2 }
 0x2a3   :  { %2495 = vmatprep.subr.bf16.mxu1 %v2656_v3  ;;  %2473 = vmatprep.subr.bf16.mxu0 %v2657_v4 }
 0x2a6   :  { %2496 = vmatpush3.bf16.msra.mxu1 %v2658_v5  ;;  %2474 = vmatpush3.bf16.msra.mxu0 %v2659_v6 }
 0x2a7   :  { %2497 = vmatprep.subr.bf16.mxu1 %v2660_v7  ;;  %2475 = vmatprep.subr.bf16.mxu0 %v2661_v8 }
 0x2aa   :  { %2498 = vmatpush3.bf16.msra.mxu1 %v2662_v9  ;;  %2476 = vmatpush3.bf16.msra.mxu0 %v2663_v10 }
 0x2ab   :  { %2499 = vmatprep.subr.bf16.mxu1 %v2664_v11  ;;  %2477 = vmatprep.subr.bf16.mxu0 %v2665_v13 }
 0x2ae   :  { %2500 = vmatpush3.bf16.msra.mxu1 %v2666_v14  ;;  %2478 = vmatpush3.bf16.msra.mxu0 %v2667_v15 }
 0x2af   :  { %2501 = vmatprep.subr.bf16.mxu1 %v2668_v16  ;;  %2479 = vmatprep.subr.bf16.mxu0 %v2669_v17 }
 0x2b2   :  { %2502 = vmatpush3.bf16.msra.mxu1 %v2670_v18  ;;  %2480 = vmatpush3.bf16.msra.mxu0 %v2671_v19 }
 0x2b3   :  { %2582 = vmatprep.subr.bf16.mxu0 %v2892_v0  ;;  %2518 = vmatprep.subr.bf16.mxu1 %v2672_v20 }
 0x348   :  { %v3019_v21 = vpop.f32.mrb[4].mxu0  ;;  %v3021_v12 = vpop.f32.mrb[4].mxu1 }
 0x349   :  { %v988_v22 = vrot.slane %v3019_v21, 4  ;;  %v1036_v23 = vmul.f32 %v3019_v21, %v3019_v21  ;;  %v1000_v24 = vrot.slane %v3021_v12, 4  ;;  %v1038_v25 = vmul.f32 %v3021_v12, %v3021_v12  ;;  %v3029_v26 = vpop.f32.mrb[5].mxu0  ;;  %v3031_v27 = vpop.f32.mrb[5].mxu1 }
 0x34a   :  { %v994_v28 = vrot.slane %v3029_v26, 4  ;;  %v1037_v29 = vmul.f32 %v3029_v26, %v3029_v26  ;;  %v1006_v30 = vrot.slane %v3031_v27, 4  ;;  %v1039_v31 = vmul.f32 %v3031_v27, %v3031_v27  ;;  %v860_v32 = vpop.f32.mrb[6].mxu0  ;;  %v901_v33 = vpop.f32.mrb[6].mxu1 }
 0x34b   :  { %v989_v34 = vadd.f32 %v988_v22, %v3019_v21  ;;  %v1044_v35 = vrot.slane %v1036_v23, 4  ;;  %v1001_v36 = vadd.f32 %v1000_v24, %v3021_v12  ;;  %v1056_v37 = vrot.slane %v1038_v25, 4  ;;  %v861_v38 = vpop.f32.mrb[7].mxu0  ;;  %v902_v39 = vpop.f32.mrb[7].mxu1 }
 0x34c   :  { %v995_v40 = vadd.f32 %v994_v28, %v3029_v26  ;;  %v1050_v41 = vrot.slane %v1037_v29, 4  ;;  %v1007_v42 = vadd.f32 %v1006_v30, %v3031_v27  ;;  %v1062_v43 = vrot.slane %v1039_v31, 4 }
 0x34d   :  { %v990_v44 = vrot.slane %v989_v34, 2  ;;  %v1045_v45 = vadd.f32 %v1044_v35, %v1036_v23  ;;  %v1002_v46 = vrot.slane %v1001_v36, 2  ;;  %v1057_v47 = vadd.f32 %v1056_v37, %v1038_v25 }
 0x34e   :  { %v996_v48 = vrot.slane %v995_v40, 2  ;;  %v1051_v49 = vadd.f32 %v1050_v41, %v1037_v29  ;;  %v1008_v50 = vrot.slane %v1007_v42, 2  ;;  %v1063_v51 = vadd.f32 %v1062_v43, %v1039_v31 }
 0x34f   :  { %v991_v52 = vadd.f32 %v990_v44, %v989_v34  ;;  %v1046_v53 = vrot.slane %v1045_v45, 2  ;;  %v1003_v54 = vadd.f32 %v1002_v46, %v1001_v36  ;;  %v1058_v56 = vrot.slane %v1057_v47, 2 }
 0x350   :  { %v997_v59 = vadd.f32 %v996_v48, %v995_v40  ;;  %v1052_v60 = vrot.slane %v1051_v49, 2  ;;  %v1009_v61 = vadd.f32 %v1008_v50, %v1007_v42  ;;  %v1064_v58 = vrot.slane %v1063_v51, 2 }
 0x351   :  { %v992_v62 = vrot.slane %v991_v52, 1  ;;  %v1047_v63 = vadd.f32 %v1046_v53, %v1045_v45  ;;  %v1004_v1 = vrot.slane %v1003_v54, 1  ;;  %v1059_v2 = vadd.f32 %v1058_v56, %v1057_v47 }
 0x352   :  { %v998_v3 = vrot.slane %v997_v59, 1  ;;  %v1053_v4 = vadd.f32 %v1052_v60, %v1051_v49  ;;  %v1010_v5 = vrot.slane %v1009_v61, 1  ;;  %v1065_v6 = vadd.f32 %v1064_v58, %v1063_v51 }
 0x353   :  { %v993_v7 = vadd.f32 %v992_v62, %v991_v52  ;;  %v1048_v8 = vrot.slane %v1047_v63, 1  ;;  %v1005_v9 = vadd.f32 %v1004_v1, %v1003_v54  ;;  %v1060_v10 = vrot.slane %v1059_v2, 1 }
 0x354   :  { %v999_v11 = vadd.f32 %v998_v3, %v997_v59  ;;  %v1054_v13 = vrot.slane %v1053_v4, 1  ;;  %v1011_v14 = vadd.f32 %v1010_v5, %v1009_v61  ;;  %v1066_v15 = vrot.slane %v1065_v6, 1 }
 0x355   :  { %v1049_v16 = vadd.f32 %v1048_v8, %v1047_v63  ;;  %v3043_v17 = vmul.f32 0.125, %v993_v7  ;;  %v1061_v18 = vadd.f32 %v1060_v10, %v1059_v2  ;;  %v3045_v19 = vmul.f32 0.125, %v1005_v9 }
 0x356   :  { %v1055_v20 = vadd.f32 %v1054_v13, %v1053_v4  ;;  %v3047_v22 = vmul.f32 0.125, %v999_v11  ;;  %v1067_v23 = vadd.f32 %v1066_v15, %v1065_v6  ;;  %v3049_v24 = vmul.f32 0.125, %v1011_v14 }
 0x357   :  { %v1100_v25 = vmul.f32 0.125, %v1049_v16  ;;  %v1108_v28 = vmul.f32 %v3043_v17, %v3043_v17  ;;  %v1102_v29 = vmul.f32 0.125, %v1061_v18  ;;  %v1110_v30 = vmul.f32 %v3045_v19, %v3045_v19 }
 0x358   :  { %v1101_v31 = vmul.f32 0.125, %v1055_v20  ;;  %v1109_v32 = vmul.f32 %v3047_v22, %v3047_v22  ;;  %v1103_v33 = vmul.f32 0.125, %v1067_v23  ;;  %v1111_v34 = vmul.f32 %v3049_v24, %v3049_v24 }
 0x359   :  { %v1116_v35 = vsub.f32 %v1100_v25, %v1108_v28  ;;  %v1118_v36 = vsub.f32 %v1102_v29, %v1110_v30  ;;  %v2895_v47 = vmov 1966171168  }
 0x35a   :  { %v1117_v37 = vsub.f32 %v1101_v31, %v1109_v32  ;;  %v1119_v38 = vsub.f32 %v1103_v33, %v1111_v34  ;;  %v1161_v48 = vunpack.c.l.s4 %v2895_v47 }
 0x35b   :  { %v1124_v39 = vmax.f32 %v1116_v35, 0.0  ;;  %v1126_v40 = vmax.f32 %v1118_v36, 0.0 }
 0x35c   :  { %v1125_v41 = vmax.f32 %v1117_v37, 0.0  ;;  %v1127_v42 = vmax.f32 %v1119_v38, 0.0  ;;  %v1162_v49 = vunpack.c.0.s8 %v1161_v48 }
 0x35d   :  { %v1132_v43 = vadd.f32 1e-05, %v1124_v39  ;;  %v1134_v44 = vadd.f32 1e-05, %v1126_v40 }
 0x35e   :  { %v1133_v45 = vadd.f32 1e-05, %v1125_v41  ;;  %v1135_v46 = vadd.f32 1e-05, %v1127_v42  ;;  %v3060_v50 = vsub.s32 %v1162_v49, %v2987_v55 }
 0x35f   :  { %2716 = vrsqrt.f32 %v1132_v43 }
 0x360   :  { %2718 = vrsqrt.f32 %v1134_v44 }
 0x361   :  { %2720 = vrsqrt.f32 %v1133_v45 }
 0x362   :  { %2722 = vrsqrt.f32 %v1135_v46 }
 0x368   :  { %v3062_v51 = vpop.f32.mrb[8].mxu0  ;;  %v3064_v52 = vpop.f32.mrb[8].mxu1 }
 0x369   :  { %v2717_v53 = vpop.eup %2716  ;;  %v1012_v54 = vrot.slane %v3062_v51, 4  ;;  %v1040_v56 = vmul.f32 %v3062_v51, %v3062_v51  ;;  %v1024_v59 = vrot.slane %v3064_v52, 4  ;;  %v1042_v60 = vmul.f32 %v3064_v52, %v3064_v52  ;;  %v3072_v61 = vpop.f32.mrb[9].mxu0 }
 0x36a   :  { %v3074_v58 = vpop.f32.mrb[9].mxu1  ;;  %v2719_v62 = vpop.eup %2718  ;;  %v1018_v63 = vrot.slane %v3072_v61, 4  ;;  %v1041_v1 = vmul.f32 %v3072_v61, %v3072_v61 }
 0x36b   :  { %v1030_v2 = vrot.slane %v3074_v58, 4  ;;  %v1043_v3 = vmul.f32 %v3074_v58, %v3074_v58  ;;  %v942_v4 = vpop.f32.mrb[10].mxu0  ;;  %v983_v5 = vpop.f32.mrb[10].mxu1  ;;  %v1013_v7 = vadd.f32 %v1012_v54, %v3062_v51  ;;  %v1068_v8 = vrot.slane %v1040_v56, 4 }
 0x36c   :  { %v2721_v6 = vpop.eup %2720  ;;  %v1025_v9 = vadd.f32 %v1024_v59, %v3064_v52  ;;  %v1080_v10 = vrot.slane %v1042_v60, 4  ;;  %v943_v11 = vpop.f32.mrb[11].mxu0  ;;  %v1019_v16 = vadd.f32 %v1018_v63, %v3072_v61  ;;  %v1074_v18 = vrot.slane %v1041_v1, 4 }
 0x36d   :  { %v984_v13 = vpop.f32.mrb[11].mxu1  ;;  %v2723_v14 = vpop.eup %2722  ;;  %v1156_v15 = vcombine.low %v2717_v53, %v2721_v6  ;;  %v1031_v20 = vadd.f32 %v1030_v2, %v3074_v58  ;;  %v1014_v25 = vrot.slane %v1013_v7, 2  ;;  %v1069_v28 = vadd.f32 %v1068_v8, %v1040_v56 }
 0x36e   :  { %v1157_v23 = vcombine.low %v2719_v62, %v2723_v14  ;;  %v1026_v29 = vrot.slane %v1025_v9, 2  ;;  %v1081_v31 = vadd.f32 %v1080_v10, %v1042_v60  ;;  %v1020_v32 = vrot.slane %v1019_v16, 2 }
 0x36f   :  { %v3087_v30 = vrot.slane %v1156_v15, %v3060_v50  ;;  %v1075_v33 = vadd.f32 %v1074_v18, %v1041_v1  ;;  %v1015_v35 = vadd.f32 %v1014_v25, %v1013_v7  ;;  %v1070_v36 = vrot.slane %v1069_v28, 2 }
 0x370   :  { %v3090_v34 = vrot.slane %v1157_v23, %v3060_v50  ;;  %v1027_v37 = vadd.f32 %v1026_v29, %v1025_v9  ;;  %v1082_v38 = vrot.slane %v1081_v31, 2  ;;  %v1021_v39 = vadd.f32 %v1020_v32, %v1019_v16 }
 0x371   :  { %v1076_v40 = vrot.slane %v1075_v33, 2  ;;  %v1032_v41 = vrot.slane %v1031_v20, 2  ;;  %v1016_v43 = vrot.slane %v1015_v35, 1  ;;  %v1071_v44 = vadd.f32 %v1070_v36, %v1069_v28 }
 0x372   :  { %v1188_v42 = vcombine.low %v3087_v30, %v3090_v34  ;;  %v1028_v45 = vrot.slane %v1027_v37, 1  ;;  %v1083_v46 = vadd.f32 %v1082_v38, %v1081_v31  ;;  %v1022_v47 = vrot.slane %v1021_v39, 1 }
 0x373   :  { %v1077_v48 = vadd.f32 %v1076_v40, %v1075_v33  ;;  %v1033_v49 = vadd.f32 %v1032_v41, %v1031_v20  ;;  %v1017_v53 = vadd.f32 %v1016_v43, %v1015_v35  ;;  %v1072_v54 = vrot.slane %v1071_v44, 1 }
 0x374   :  { %v1029_v56 = vadd.f32 %v1028_v45, %v1027_v37  ;;  %v1084_v59 = vrot.slane %v1083_v46, 1  ;;  %v1023_v60 = vadd.f32 %v1022_v47, %v1021_v39  ;;  %v1086_v5 = vrot.slane %v1043_v3, 4 }
 0x375   :  { %v1078_v62 = vrot.slane %v1077_v48, 1  ;;  %v1034_v63 = vrot.slane %v1033_v49, 1  ;;  %v1073_v1 = vadd.f32 %v1072_v54, %v1071_v44  ;;  %v3094_v2 = vmul.f32 0.125, %v1017_v53 }
 0x376   :  { %v3096_v4 = vmul.f32 0.125, %v1029_v56  ;;  %v1085_v6 = vadd.f32 %v1084_v59, %v1083_v46  ;;  %v1097_v8 = vmul.f32 0.125, %v1023_v60  ;;  %v1087_v14 = vadd.f32 %v1086_v5, %v1043_v3 }
 0x377   :  { %v1079_v7 = vadd.f32 %v1078_v62, %v1077_v48  ;;  %v1035_v9 = vadd.f32 %v1034_v63, %v1033_v49  ;;  %v1104_v10 = vmul.f32 0.125, %v1073_v1  ;;  %v1112_v11 = vmul.f32 %v3094_v2, %v3094_v2  ;;  %v986_v62 = vld [vmem:[#allocation9 + $0x4] sm:$0xff] }
 0x378   :  { %v1114_v13 = vmul.f32 %v3096_v4, %v3096_v4  ;;  %v1106_v15 = vmul.f32 0.125, %v1085_v6  ;;  %v1113_v18 = vmul.f32 %v1097_v8, %v1097_v8  ;;  %v1088_v23 = vrot.slane %v1087_v14, 2 }
 0x379   :  { %v1105_v16 = vmul.f32 0.125, %v1079_v7  ;;  %v1120_v20 = vsub.f32 %v1104_v10, %v1112_v11  ;;  %v1099_v31 = vmul.f32 0.125, %v1035_v9  ;;  %v1196_v59 = vrot.slane %v1188_v42, %v3060_v50 }
 0x37a   :  { %v1122_v29 = vsub.f32 %v1106_v15, %v1114_v13  ;;  %v1089_v30 = vadd.f32 %v1088_v23, %v1087_v14  ;;  %v1226_v63 = vsub.s32 4, %v2987_v55  ;;  %v1230_v5 = vsub.s32 5, %v2987_v55 }
 0x37b   :  { %v1121_v25 = vsub.f32 %v1105_v16, %v1113_v18  ;;  %v1128_v28 = vmax.f32 %v1120_v20, 0.0  ;;  %v1115_v38 = vmul.f32 %v1099_v31, %v1099_v31  ;;  %v1234_v6 = vsub.s32 6, %v2987_v55 }
 0x37c   :  { %v1090_v34 = vrot.slane %v1089_v30, 1  ;;  %v1130_v36 = vmax.f32 %v1122_v29, 0.0  ;;  %v1238_v7 = vsub.s32 7, %v2987_v55  ;;  %v1214_v9 = vsub.s32 1, %v2987_v55 }
 0x37d   :  { %v1129_v32 = vmax.f32 %v1121_v25, 0.0  ;;  %v1136_v33 = vadd.f32 1e-05, %v1128_v28  ;;  %v1218_v10 = vsub.s32 2, %v2987_v55  ;;  %v1222_v11 = vsub.s32 3, %v2987_v55 }
 0x37e   :  { %v1091_v37 = vadd.f32 %v1090_v34, %v1089_v30  ;;  %v1138_v39 = vadd.f32 1e-05, %v1130_v36 }
 0x37f   :  { %v1137_v35 = vadd.f32 1e-05, %v1129_v32  ;;  %2724 = vrsqrt.f32 %v1136_v33 }
 0x380   :  { %v1107_v3 = vmul.f32 0.125, %v1091_v37 }
 0x381   :  { %2726 = vrsqrt.f32 %v1137_v35 }
 0x382   :  { %v1123_v40 = vsub.f32 %v1107_v3, %v1115_v38  ;;  %2728 = vrsqrt.f32 %v1138_v39 }
 0x384   :  { %v1131_v41 = vmax.f32 %v1123_v40, 0.0 }
 0x386   :  { %v1139_v43 = vadd.f32 1e-05, %v1131_v41 }
 0x388   :  { %2730 = vrsqrt.f32 %v1139_v43  ;;  %v987_v43 = vld [vmem:[#allocation9 + $0xc] sm:$0xff] }
 0x389   :  { %v2725_v44 = vpop.eup %2724 }
 0x38b   :  { %v2727_v45 = vpop.eup %2726 }
 0x38c   :  { %v1158_v46 = vcombine.low %v2725_v44, %v2727_v45  ;;  %v2729_v47 = vpop.eup %2728 }
 0x38e   :  { %v1180_v49 = vrot.slane %v1158_v46, %v3060_v50 }
 0x392   :  { %v2731_v48 = vpop.eup %2730 }
 0x393   :  { %v1159_v53 = vcombine.low %v2729_v47, %v2731_v48 }
 0x395   :  { %v1187_v54 = vrot.slane %v1159_v53, %v3060_v50 }
 0x397   :  { %v1189_v56 = vcombine.low %v1180_v49, %v1187_v54 }
 0x399   :  { %v1203_v60 = vrot.slane %v1189_v56, %v3060_v50 }
 0x39b   :  { %v1204_v1 = vcombine.low %v1196_v59, %v1203_v60 }
 0x39d   :  { %v1206_v13 = vmul.f32 %v1204_v1, %v986_v62 }
 0x39f   :  { %v1227_v42 = vrot.slane %v1206_v13, %v1226_v63  ;;  %v1231_v14 = vrot.slane %v1206_v13, %v1230_v5  ;;  %v1235_v15 = vrot.slane %v1206_v13, %v1234_v6  ;;  %v1239_v16 = vrot.slane %v1206_v13, %v1238_v7 }
 0x3a0   :  { %v1211_v18 = vrot.slane %v1206_v13, %v2990_v57  ;;  %v1215_v20 = vrot.slane %v1206_v13, %v1214_v9  ;;  %v1219_v23 = vrot.slane %v1206_v13, %v1218_v10  ;;  %v1223_v25 = vrot.slane %v1206_v13, %v1222_v11 }
 0x3a1   :  { %v1252_v28 = vmul.f32 %v1227_v42, %v3094_v2  ;;  %v1253_v29 = vmul.f32 %v1231_v14, %v1097_v8  ;;  %v1254_v30 = vmul.f32 %v1235_v15, %v3096_v4  ;;  %v1255_v32 = vmul.f32 %v1239_v16, %v1099_v31 }
 0x3a2   :  { %v1322_v33 = vmul.f32 %v1239_v16, %v3074_v58  ;;  %v1248_v55 = vmul.f32 %v1211_v18, %v3043_v17  ;;  %v1249_v34 = vmul.f32 %v1215_v20, %v3047_v22  ;;  %v1250_v35 = vmul.f32 %v1219_v23, %v3045_v19  ;;  %v2674_v16 = vld [vmem:[#allocation6 + $0x248] sm:$0xff]  }
 0x3a3   :  { %v1266_v36 = vcombine.low %v1252_v28, %v1253_v29  ;;  %v1267_v37 = vcombine.low %v1254_v30, %v1255_v32  ;;  %v1251_v38 = vmul.f32 %v1223_v25, %v3049_v24  ;;  %v1316_v3 = vmul.f32 %v1215_v20, %v3029_v26  ;;  %v2675_v20 = vld [vmem:[#allocation6 + $0x208] sm:$0xff]   ;;  %v2678_v28 = vld [vmem:[#allocation6 + $0x258] sm:$0xff]   ;;  %v2680_v30 = vld [vmem:[#allocation6 + $0x260] sm:$0xff]  }
 0x3a4   :  { %v1264_v39 = vcombine.low %v1248_v55, %v1249_v34  ;;  %v1318_v2 = vmul.f32 %v1223_v25, %v3031_v27  ;;  %v1315_v4 = vmul.f32 %v1211_v18, %v3019_v21  ;;  %v1317_v8 = vmul.f32 %v1219_v23, %v3021_v12  ;;  %v2676_v23 = vld [vmem:[#allocation6 + $0x250] sm:$0xff]   ;;  %v2679_v29 = vld [vmem:[#allocation6 + $0x218] sm:$0xff]   ;;  %v2681_v32 = vld [vmem:[#allocation6 + $0x220] sm:$0xff]  }
 0x3a5   :  { %v1288_v58 = vrot.slane %v1266_v36, %v3060_v50  ;;  %v1295_v17 = vrot.slane %v1267_v37, %v3060_v50  ;;  %v1265_v22 = vcombine.low %v1250_v35, %v1251_v38  ;;  %v1320_v19 = vmul.f32 %v1231_v14, %v3072_v61  ;;  %v2677_v25 = vld [vmem:[#allocation6 + $0x210] sm:$0xff]   ;;  %v2683_v55 = vld [vmem:[#allocation6 + $0x228] sm:$0xff]   ;;  %v2686_v36 = vld [vmem:[#allocation6 + $0x278] sm:$0xff]  }
 0x3a6   :  { %v1274_v31 = vrot.slane %v1264_v39, %v3060_v50  ;;  %v1319_v24 = vmul.f32 %v1227_v42, %v3062_v51  ;;  %v1321_v26 = vmul.f32 %v1235_v15, %v3064_v52  ;;  %v2684_v34 = vld [vmem:[#allocation6 + $0x270] sm:$0xff]   ;;  %v2687_v37 = vld [vmem:[#allocation6 + $0x238] sm:$0xff]   ;;  %v2688_v39 = vld [vmem:[#allocation6 + $0x1c0] sm:$0xff]  }
 0x3a7   :  { %v1297_v40 = vcombine.low %v1288_v58, %v1295_v17  ;;  %v1281_v27 = vrot.slane %v1265_v22, %v3060_v50  ;;  %v2685_v35 = vld [vmem:[#allocation6 + $0x230] sm:$0xff]   ;;  %v2692_v58 = vld [vmem:[#allocation6 + $0x1e0] sm:$0xff]   ;;  %v2693_v17 = vld [vmem:[#allocation6 + $0x1e8] sm:$0xff]  }
 0x3a8   :  { %v2694_v22 = vld [vmem:[#allocation6 + $0x1f0] sm:$0xff]  }
 0x3a9   :  { %v1311_v21 = vrot.slane %v1297_v40, %v3060_v50  ;;  %v1296_v41 = vcombine.low %v1274_v31, %v1281_v27  ;;  %v2696_v31 = vld [vmem:[#allocation6 + $0x2c0] sm:$0xff]  }
 0x3ab   :  { %v1304_v12 = vrot.slane %v1296_v41, %v3060_v50 }
 0x3ad   :  { %v1312_v44 = vcombine.low %v1304_v12, %v1311_v21 }
 0x3af   :  { %v1314_v45 = vsub.f32 %v987_v43, %v1312_v44 }
 0x3b1   :  { %v1331_v46 = vrot.slane %v1314_v45, %v1214_v9  ;;  %v1339_v47 = vrot.slane %v1314_v45, %v1222_v11  ;;  %v1327_v61 = vrot.slane %v1314_v45, %v2990_v57  ;;  %v1335_v48 = vrot.slane %v1314_v45, %v1218_v10 }
 0x3b2   :  { %v1347_v49 = vrot.slane %v1314_v45, %v1230_v5  ;;  %v1343_v51 = vrot.slane %v1314_v45, %v1226_v63  ;;  %v1355_v53 = vrot.slane %v1314_v45, %v1238_v7  ;;  %v1351_v52 = vrot.slane %v1314_v45, %v1234_v6  ;;  %v2673_v6 = vld [vmem:[#allocation6 + $0x200] sm:$0xff]  }
 0x3b3   :  { %v1365_v54 = vadd.f32 %v1331_v46, %v1316_v3  ;;  %v1367_v56 = vadd.f32 %v1339_v47, %v1318_v2  ;;  %v1364_v59 = vadd.f32 %v1327_v61, %v1315_v4  ;;  %v1366_v60 = vadd.f32 %v1335_v48, %v1317_v8  ;;  %v2689_v2 = vld [vmem:[#allocation6 + $0x1c8] sm:$0xff]   ;;  %v2690_v4 = vld [vmem:[#allocation6 + $0x1d0] sm:$0xff]   ;;  %v2691_v8 = vld [vmem:[#allocation6 + $0x1d8] sm:$0xff]  }
 0x3b4   :  { %v1369_v62 = vadd.f32 %v1347_v49, %v1320_v19  ;;  %v1368_v1 = vadd.f32 %v1343_v51, %v1319_v24  ;;  %v3135_v13 = vadd.f32 %v1355_v53, %v1322_v33  ;;  %v3137_v50 = vadd.f32 %v1351_v52, %v1321_v26  ;;  %v2682_v33 = vld [vmem:[#allocation6 + $0x268] sm:$0xff]   ;;  %v2695_v19 = vld [vmem:[#allocation6 + $0x1f8] sm:$0xff]  }
 0x3b5   :  { %v1373_v42 = vmax.f32 %v1365_v54, 0.0  ;;  %v1375_v9 = vmax.f32 %v1367_v56, 0.0  ;;  %v1372_v11 = vmax.f32 %v1364_v59, 0.0  ;;  %v1374_v14 = vmax.f32 %v1366_v60, 0.0 }
 0x3b6   :  { %v1377_v15 = vmax.f32 %v1369_v62, 0.0  ;;  %v1376_v38 = vmax.f32 %v1368_v1, 0.0 }
 0x3b7   :  { %v1445_v10 = vpack.c.bf16 %v1373_v42, %v1373_v42  ;;  %v1447_v5 = vpack.c.bf16 %v1375_v9, %v1375_v9  ;;  %v1444_v63 = vpack.c.bf16 %v1372_v11, %v1372_v11  ;;  %v1446_v7 = vpack.c.bf16 %v1374_v14, %v1374_v14 }
 0x3b8   :  { %v1948_v18 = vpack.c.bf16 %v1377_v15, %v1377_v15  ;;  %v1947_v3 = vpack.c.bf16 %v1376_v38, %v1376_v38 }
 0x3b9   :  { %1672 = vmatprep.mubr.bf16.mxu0 %v1445_v10  ;;  %1712 = vmatprep.mubr.bf16.mxu1 %v1447_v5 }
 0x3ba   :  { %1673 = vmatmul.mubr.bf16.vlgmr.msra.gmra.mrb[12].mxu0 %v1444_v63  ;;  %1713 = vmatmul.mubr.bf16.vlgmr.msra.gmra.mrb[12].mxu1 %v1446_v7 }
 0x3bb   :  { %2519 = vmatpush3.bf16.msra.mxu1 %v2673_v6  ;;  %2182 = vmatprep.mubr.bf16.mxu1 %v1948_v18 }
 0x3bc   :  { %2520 = vmatprep.subr.bf16.mxu1 %v2674_v16  ;;  %2598 = vmatprep.mubr.msk.bf16.mxu0 %vm2893_vm1, %v2892_v0  ;;  %v1720_v16 = vld [vmem:[#allocation9 + $0x14] sm:$0x1] }
 0x3bd   :  { %2583 = vmatpush3.bf16.msra.mxu0 %v2688_v39  ;;  %v2700_v39 = vld [vmem:[#allocation6 + $0x2d0] sm:$0xff]  }
 0x3be   :  { %2584 = vmatprep.subr.bf16.mxu0 %v2892_v0 }
 0x3bf   :  { %2521 = vmatpush3.bf16.msra.mxu1 %v2675_v20 }
 0x3c0   :  { %2522 = vmatprep.subr.bf16.mxu1 %v2676_v23  ;;  %v1721_v23 = vld [vmem:[#allocation9 + $0x15] sm:$0x1] }
 0x3c1   :  { %2585 = vmatpush3.bf16.msra.mxu0 %v2689_v2  ;;  %v2701_v2 = vld [vmem:[#allocation6 + $0x290] sm:$0xff]  }
 0x3c2   :  { %2586 = vmatprep.subr.bf16.mxu0 %v2892_v0 }
 0x3c3   :  { %2523 = vmatpush3.bf16.msra.mxu1 %v2677_v25 }
 0x3c4   :  { %2524 = vmatprep.subr.bf16.mxu1 %v2678_v28 }
 0x3c5   :  { %2587 = vmatpush3.bf16.msra.mxu0 %v2690_v4  ;;  %v2702_v4 = vld [vmem:[#allocation6 + $0x2d8] sm:$0xff]  }
 0x3c6   :  { %2588 = vmatprep.subr.bf16.mxu0 %v2892_v0 }
 0x3c7   :  { %2525 = vmatpush3.bf16.msra.mxu1 %v2679_v29 }
 0x3c8   :  { %2526 = vmatprep.subr.bf16.mxu1 %v2680_v30 }
 0x3c9   :  { %2589 = vmatpush3.bf16.msra.mxu0 %v2691_v8  ;;  %v2704_v8 = vld [vmem:[#allocation6 + $0x2e0] sm:$0xff]  }
 0x3ca   :  { %2590 = vmatprep.subr.bf16.mxu0 %v2892_v0 }
 0x3cb   :  { %2527 = vmatpush3.bf16.msra.mxu1 %v2681_v32 }
 0x3cc   :  { %2528 = vmatprep.subr.bf16.mxu1 %v2682_v33 }
 0x3cd   :  { %2591 = vmatpush3.bf16.msra.mxu0 %v2692_v58  ;;  %v2706_v58 = vld [vmem:[#allocation6 + $0x2e8] sm:$0xff]  }
 0x3ce   :  { %2592 = vmatprep.subr.bf16.mxu0 %v2892_v0 }
 0x3cf   :  { %2529 = vmatpush3.bf16.msra.mxu1 %v2683_v55  ;;  %v1379_v55 = vmax.f32 %v3135_v13, 0.0  ;;  %v2705_v13 = vld [vmem:[#allocation6 + $0x2a0] sm:$0xff]  }
 0x3d0   :  { %2530 = vmatprep.subr.bf16.mxu1 %v2684_v34 }
 0x3d1   :  { %2593 = vmatpush3.bf16.msra.mxu0 %v2693_v17  ;;  %v1950_v38 = vpack.c.bf16 %v1379_v55, %v1379_v55  ;;  %v2707_v17 = vld [vmem:[#allocation6 + $0x2a8] sm:$0xff]  }
 0x3d2   :  { %2594 = vmatprep.subr.bf16.mxu0 %v2892_v0 }
 0x3d3   :  { %2531 = vmatpush3.bf16.msra.mxu1 %v2685_v35  ;;  %v2697_v35 = vld [vmem:[#allocation6 + $0x280] sm:$0xff]  }
 0x3d4   :  { %2532 = vmatprep.subr.bf16.mxu1 %v2686_v36 }
 0x3d5   :  { %2595 = vmatpush3.bf16.msra.mxu0 %v2694_v22  ;;  %v2708_v22 = vld [vmem:[#allocation6 + $0x2f0] sm:$0xff]  }
 0x3d6   :  { %2596 = vmatprep.subr.bf16.mxu0 %v2892_v0 }
 0x3d7   :  { %2533 = vmatpush3.bf16.msra.mxu1 %v2687_v37  ;;  %v2698_v37 = vld [vmem:[#allocation6 + $0x2c8] sm:$0xff]  }
 0x3d9   :  { %2597 = vmatpush3.bf16.msra.mxu0 %v2695_v19  ;;  %v2709_v19 = vld [vmem:[#allocation6 + $0x2b0] sm:$0xff]  }
 0x3da   :  { %2183 = vmatmul.mubr.bf16.vlgmr.msra.gmra.mrb[16].mxu1 %v1947_v3  ;;  %2540 = vmatprep.subr.bf16.mxu0 %v2696_v31  ;;  %v2699_v3 = vld [vmem:[#allocation6 + $0x288] sm:$0xff]   ;;  %v2710_v31 = vld [vmem:[#allocation6 + $0x2f8] sm:$0xff]  }
 0x48d   :  { %v2481_v24 = vpop.f32.mrb[12].mxu0  ;;  %v2503_v26 = vpop.f32.mrb[12].mxu1 }
 0x48e   :  { %v2482_v40 = vpop.f32.mrb[13].mxu0  ;;  %v2504_v27 = vpop.f32.mrb[13].mxu1 }
 0x48f   :  { %v2483_v21 = vadd.f32 %v2482_v40, %v2481_v24  ;;  %v2505_v41 = vadd.f32 %v2504_v27, %v2503_v26  ;;  %v2484_v12 = vpop.f32.mrb[14].mxu0  ;;  %v2506_v43 = vpop.f32.mrb[14].mxu1  ;;  %v2711_v24 = vld [vmem:[#allocation6 + $0x2b8] sm:$0xff]   ;;  %v1378_v26 = vmax.f32 %v3137_v50, 0.0  ;;  %v2392_v27 = vld [vmem:[#allocation9 + $0x16] ss:$0 sm:$0xff] }
 0x490   :  { %v2485_v44 = vpop.f32.mrb[15].mxu0  ;;  %v2507_v45 = vpop.f32.mrb[15].mxu1 }
 0x491   :  { %v1715_v46 = vadd.f32 %v2505_v41, %v2483_v21  ;;  %v1949_v40 = vpack.c.bf16 %v1378_v26, %v1378_v26  ;;  %v2401_v45 = vld [vmem:[#allocation9 + $0x17] ss:$0 sm:$0xff] }
 0x493   :  { %v1722_v47 = vrot.slane %v1715_v46, 4  ;;  %v1728_v61 = vmul.f32 %v1715_v46, %v1715_v46 }
 0x495   :  { %v1723_v48 = vadd.f32 %v1722_v47, %v1715_v46  ;;  %v1729_v49 = vrot.slane %v1728_v61, 4 }
 0x497   :  { %v1724_v51 = vrot.slane %v1723_v48, 2  ;;  %v1730_v0 = vadd.f32 %v1729_v49, %v1728_v61 }
 0x499   :  { %v1725_v53 = vadd.f32 %v1724_v51, %v1723_v48  ;;  %v1731_v52 = vrot.slane %v1730_v0, 2 }
 0x49b   :  { %v1726_v54 = vrot.slane %v1725_v53, 1  ;;  %v1732_v56 = vadd.f32 %v1731_v52, %v1730_v0 }
 0x49d   :  { %v1727_v59 = vadd.f32 %v1726_v54, %v1725_v53  ;;  %v1733_v60 = vrot.slane %v1732_v56, 1 }
 0x49f   :  { %v1734_v62 = vadd.f32 %v1733_v60, %v1732_v56  ;;  %v1735_v1 = vmul.f32 0.125, %v1727_v59 }
 0x4a1   :  { %v1736_v42 = vmul.f32 0.125, %v1734_v62  ;;  %v1737_v9 = vmul.f32 %v1735_v1, %v1735_v1 }
 0x4a3   :  { %v1738_v11 = vsub.f32 %v1736_v42, %v1737_v9 }
 0x4a5   :  { %v1739_v14 = vmax.f32 %v1738_v11, 0.0 }
 0x4a7   :  { %v1740_v15 = vadd.f32 1e-05, %v1739_v14 }
 0x4a9   :  { %2732 = vrsqrt.f32 %v1740_v15 }
 0x4ad   :  { %v2534_v10 = vpop.f32.mrb[16].mxu1 }
 0x4ae   :  { %v2535_v5 = vpop.f32.mrb[17].mxu1 }
 0x4af   :  { %v2536_v63 = vadd.f32 %v2535_v5, %v2534_v10  ;;  %v2537_v7 = vpop.f32.mrb[18].mxu1 }
 0x4b0   :  { %v2538_v6 = vpop.f32.mrb[19].mxu1 }
 0x4b1   :  { %v2185_v61 = vadd.f32 %v2536_v63, %v2401_v45 }
 0x4b3   :  { %v2733_v18 = vpop.eup %2732 }
 0x4b4   :  { %v1742_v20 = vmul.f32 %v2733_v18, %v1720_v16 }
 0x4b6   :  { %v1743_v25 = vmul.f32 %v1742_v20, %v1735_v1  ;;  %v1749_v28 = vrot.slane %v1742_v20, %v2990_v57 }
 0x4b8   :  { %v1744_v29 = vsub.f32 %v1721_v23, %v1743_v25  ;;  %v1751_v30 = vmul.f32 %v1749_v28, %v1715_v46 }
 0x4ba   :  { %v1756_v32 = vrot.slane %v1744_v29, %v2990_v57  ;;  %v2703_v57 = vld [vmem:[#allocation6 + $0x298] sm:$0xff]  }
 0x4bc   :  { %v1758_v33 = vadd.f32 %v1756_v32, %v1751_v30 }
 0x4be   :  { %v1759_v34 = vmax.f32 %v1758_v33, 0.0 }
 0x4c0   :  { %v1776_v36 = vpack.c.bf16 %v1759_v34, %v1759_v34 }
 0x4c2   :  { %2599 = vmatmul.mubr.bf16.vlgmr.msra.gmra.mrb[16].mxu0 %v1776_v36 }
 0x4c3   :  { %2541 = vmatpush3.bf16.msra.mxu0 %v2697_v35  ;;  %2222 = vmatprep.mubr.bf16.mxu0 %v1950_v38 }
 0x4c4   :  { %2542 = vmatprep.subr.bf16.mxu0 %v2698_v37 }
 0x4c7   :  { %2543 = vmatpush3.bf16.msra.mxu0 %v2699_v3 }
 0x4c8   :  { %2544 = vmatprep.subr.bf16.mxu0 %v2700_v39 }
 0x4cb   :  { %2545 = vmatpush3.bf16.msra.mxu0 %v2701_v2 }
 0x4cc   :  { %2546 = vmatprep.subr.bf16.mxu0 %v2702_v4 }
 0x4cf   :  { %2547 = vmatpush3.bf16.msra.mxu0 %v2703_v57 }
 0x4d0   :  { %2548 = vmatprep.subr.bf16.mxu0 %v2704_v8 }
 0x4d3   :  { %2549 = vmatpush3.bf16.msra.mxu0 %v2705_v13 }
 0x4d4   :  { %2550 = vmatprep.subr.bf16.mxu0 %v2706_v58 }
 0x4d7   :  { %2551 = vmatpush3.bf16.msra.mxu0 %v2707_v17 }
 0x4d8   :  { %2552 = vmatprep.subr.bf16.mxu0 %v2708_v22 }
 0x4db   :  { %2553 = vmatpush3.bf16.msra.mxu0 %v2709_v19 }
 0x4dc   :  { %2554 = vmatprep.subr.bf16.mxu0 %v2710_v31 }
 0x4df   :  { %2555 = vmatpush3.bf16.msra.mxu0 %v2711_v24 }
 0x4e2   :  { %2223 = vmatmul.mubr.bf16.vlgmr.msra.gmra.mrb[20].mxu0 %v1949_v40 }
 0x595   :  { %v1866_v21 = vpop.f32.mrb[16].mxu0 }
 0x596   :  { %v1867_v41 = vadd.f32 %v2392_v27, %v1866_v21  ;;  %v2600_v12 = vpop.f32.mrb[17].mxu0 }
 0x597   :  { %v1869_v43 = vpop.f32.mrb[18].mxu0 }
 0x598   :  { %1872 = vmax.xlane.f32.xlu0 %v1867_v41  ;;  %v2601_v44 = vpop.f32.mrb[19].mxu0 }
 0x5b5   :  { %v2556_v46 = vpop.f32.mrb[20].mxu0 }
 0x5b6   :  { %v2557_v47 = vpop.f32.mrb[21].mxu0 }
 0x5b7   :  { %v2558_v48 = vadd.f32 %v2557_v47, %v2556_v46  ;;  %v2559_v49 = vpop.f32.mrb[22].mxu0 }
 0x5b8   :  { %v2560_v51 = vpop.f32.mrb[23].mxu0 }
 0x5b9   :  { %v2225_v0 = vadd.f32 %v2558_v48, %v2185_v61 }
 0x5bb   :  { %2230 = vmax.xlane.f32.xlu0 %v2225_v0 }
 0x625   :  { %v1873_v50 = vpop.xlane.xlu0 %1872 }
 0x626   :  { %v1874_v53 = vsub.f32 %v1867_v41, %v1873_v50 }
 0x628   :  { %v1875_v52 = vmul.f32 1.442695, %v1874_v53 }
 0x62a   :  { %2734 = vpow2.f32 %v1875_v52 }
 0x634   :  { %v2735_v54 = vpop.eup %2734 }
 0x635   :  { %1877 = vadd.xlane.f32.xlu1 %v2735_v54 }
 0x648   :  { %v2231_v56 = vpop.xlane.xlu0 %2230 }
 0x649   :  { %v2232_v59 = vsub.f32 %v2225_v0, %v2231_v56 }
 0x64b   :  { %v2233_v60 = vmul.f32 1.442695, %v2232_v59 }
 0x64d   :  { %2736 = vpow2.f32 %v2233_v60 }
 0x657   :  { %v2737_v62 = vpop.eup %2736 }
 0x658   :  { %2235 = vadd.xlane.f32.xlu1 %v2737_v62 }
 0x6c2   :  { %v1878_v1 = vpop.xlane.xlu1 %1877 }
 0x6c3   :  { %2738 = vlog2.f32 %v1878_v1 }
 0x6cd   :  { %v2739_v42 = vpop.eup %2738 }
 0x6ce   :  { %v1880_v9 = vmul.f32 0.6931472, %v2739_v42 }
 0x6d0   :  { %v1881_v11 = vsub.f32 %v1874_v53, %v1880_v9 }
 0x6d2   :  { %1882 = vst [vmem:[#allocation11] sm:$0xff] %v1881_v11 }
 0x6d3   :  { %2841 = shalt.err (!%p2838_p8)
}
 0x6d4   :  { %s2842_s20 = scalar_lea.hbm %s3180_s4, 128 }
 0x6d5   :  { %p2843_p9 = scmp.ne.s32.totalorder %s3180_s4, %s2842_s20  ;;  %p2846_p10 = scmp.lt.u32.totalorder %s2842_s20, %s3180_s4 }
 0x6d7   :  { %p2848_p11 = pnand %p2846_p10, %p2843_p9 }
 0x6d9   :  { %2851 = shalt.err (!%p2848_p11)
}
 0x6da   :  { %2250 = dma.vmem_to_hbm [thread:$0]  %s2248_s17, 128, %s3180_s4, [#allocation5]  }
 0x6db   :  { %s2897_s27 = smov [#allocation12]  }
 0x6dc   :  { %s2257_s0 = sshll.u32 %s2897_s27, 4  ;;  %s2258_s0 = int_to_ptr.vmem [resolvable:$true] %s2257_s0 }
 0x6dd   :  { %s2852_s28 = scalar_lea.vmem %s2258_s0, 128  ;;  %p2857_p13 = scmp.lt.s32.totalorder %s2258_s0, %s2258_s0 }
 0x6de   :  { %p2853_p12 = scmp.ne.s32.totalorder %s2258_s0, %s2852_s28  ;;  %p2858_p0 = scmp.lt.s32.totalorder %s2852_s28, %s2852_s28 }
 0x6e0   :  { %p2859_p1 = por %p2858_p0, %p2857_p13 }
 0x6e2   :  { %p2860_p2 = pnand %p2859_p1, %p2853_p12 }
 0x6e5   :  { %v2236_v14 = vpop.xlane.xlu1 %2235 }
 0x6e6   :  { %2740 = vlog2.f32 %v2236_v14 }
 0x6f0   :  { %v2741_v15 = vpop.eup %2740 }
 0x6f1   :  { %v2238_v10 = vmul.f32 0.6931472, %v2741_v15 }
 0x6f3   :  { %v2239_v5 = vsub.f32 %v2232_v59, %v2238_v10 }
 0x6f5   :  { %2240 = vst [vmem:[#allocation12] sm:$0xff] %v2239_v5 }
 0x6f6   :  { %2863 = shalt.err (!%p2860_p2)
}
 0x6f7   :  { %s2864_s4 = scalar_lea.hbm %s3181_s5, 128 }
 0x6f8   :  { %p2865_p3 = scmp.ne.s32.totalorder %s3181_s5, %s2864_s4  ;;  %p2868_p4 = scmp.lt.u32.totalorder %s2864_s4, %s3181_s5 }
 0x6fa   :  { %p2870_p5 = pnand %p2868_p4, %p2865_p3 }
 0x6fc   :  { %2873 = shalt.err (!%p2870_p5)
}
 0x6fd   :  { %2260 = dma.vmem_to_hbm [thread:$0]  %s2258_s0, 128, %s3181_s5, [#allocation13]  }
 0x6fe   :  { %2880 = dma.done.wait [#allocation5], 128  }
 0x6ff   :  { %2881 = vsyncadd [#allocation5], 4294967168 }
 0x700   :  { %2882 = dma.done.wait [#allocation13], 128  }
 0x701   :  { %2883 = vsyncadd [#allocation13], 4294967168 }
 0x702   :  { %2267 = vsyncpa [#allocation4], 1 }
 0x703   :  { %2268 = vsyncpa [#allocation7], 1 }
 0x704   :  { %2269 = vsyncpa [#allocation10], 1 }
 0x705   :  { %2270 = vsyncpa [#allocation5], 1 }
 0x706   :  { %2271 = vsyncpa [#allocation13], 1 }

</bundles_post_ra>
